<compile_context>
chip_gen: v7x
topology: tpu7x:2x2x1
jax: 0.10.0
libtpu: 0.0.40
codegen_flags: <defaults>
</compile_context>

<pallas_src>
import jax
import jax.numpy as jnp
import numpy as np
from jax.experimental import pallas as pl
from jax.experimental.pallas import tpu as pltpu

H = W = 16
HW = H * W                       # 256 spatial positions
C_IN = 3
C_MID = 64
C_OUT = 32
K = 3
K_IM2COL = C_IN * K * K          # 27
K_PAD = 32                       # im2col contraction dim padded 27 -> 32
NUM_CLASSES = 10
FC_COLS = NUM_CLASSES * C_OUT    # 320
OUT_PAD = 128                    # lane-dense logits slab (classes 10 -> 128)
BN_EPS = 1e-5
MAX_TB = 8                       # batch-tile cap (VMEM-safe on all gens)


# ----------------------------- Pallas kernel ------------------------------- #

def _fused_kernel(patches_ref, w1_ref, b1_ref, w2_ref, b2_ref,
                  e_ref, wcat_ref, bd_ref, rsel_ref, bfc_ref, out_ref):
    """conv1+BN+ReLU -> 1x1 conv+BN+ReLU -> Linear for TB images per step."""
    tb = patches_ref.shape[0]
    p = patches_ref[...].reshape(tb * HW, K_PAD)                  # bf16

    # 3x3 conv as an im2col matmul (BN scale pre-folded into w1) + shift+ReLU.
    h1 = jnp.dot(p, w1_ref[...], preferred_element_type=jnp.float32)
    h1 = jnp.maximum(h1 + b1_ref[...], 0.0)                       # (tb*256, 64) f32

    # 1x1 distill conv (BN scale pre-folded into w2) + shift + ReLU.
    h2 = jnp.dot(h1.astype(jnp.bfloat16), w2_ref[...],
                 preferred_element_type=jnp.float32)
    h2 = jnp.maximum(h2 + b2_ref[...], 0.0)                       # (tb*256, 32) f32

    # Fused FC: replicate channels per class (E), weight with the class-major
    # FC weight (wcat broadcast in-kernel over the batch tile), reduce the
    # positions on the MXU with a block-diagonal ones matmul, then select the
    # per-class sums and add the bias into a lane-dense (tb, 128) slab.
    h2e = jnp.dot(h2.astype(jnp.bfloat16), e_ref[...],
                  preferred_element_type=jnp.float32)             # (tb*256, 320)
    prod = (h2e.reshape(tb, HW, FC_COLS)
            * wcat_ref[...][None].astype(jnp.float32)).reshape(tb * HW, FC_COLS)
    t = jnp.dot(bd_ref[...], prod, preferred_element_type=jnp.float32)  # (tb, 320)
    out_ref[0] = (jnp.dot(t, rsel_ref[...], preferred_element_type=jnp.float32)
                  + bfc_ref[...])                                 # (tb, 128)


# ------------------------------- Wrapper ----------------------------------- #

def _fold_bn(gamma, beta, mean, var, conv_bias):
    """Fold eval-mode BatchNorm (+ conv bias) into per-channel scale/shift."""
    scale = gamma / jnp.sqrt(var + BN_EPS)
    shift = beta + scale * (conv_bias - mean)
    return scale[None, :].astype(jnp.float32), shift[None, :].astype(jnp.float32)


def svtr_compact_forward(x_nchw, params, tile_b=None):
    B = x_nchw.shape[0]
    # Batch tile: amortize per-step overhead; keep >= 2 grid steps (TB <= B/2)
    # so the "parallel" axis can shard across both v7x TensorCores.
    TB = tile_b if tile_b is not None else min(MAX_TB, max(1, B // 2))
    NB = -(-B // TB)                     # cdiv
    B_pad = NB * TB

    # JumbleModule: identity in eval mode.

    # im2col for the 3x3 / pad=1 conv, in bf16 (cheap glue; fusible into the
    # pallas_call input via allow_input_fusion).  Column order (ci, kh, kw)
    # matches torch's weight.reshape(Cout, Cin*KH*KW) flattening.
    x = x_nchw.astype(jnp.bfloat16)
    if B_pad != B:
        x = jnp.pad(x, ((0, B_pad - B), (0, 0), (0, 0), (0, 0)))
    x_sp = jnp.pad(x, ((0, 0), (0, 0), (1, 1), (1, 1)))
    cols = [x_sp[:, ci, kh:kh + H, kw:kw + W]
            for ci in range(C_IN) for kh in range(K) for kw in range(K)]
    patches = jnp.stack(cols, axis=-1).reshape(B_pad, HW, K_IM2COL)
    patches = jnp.pad(patches, ((0, 0), (0, 0), (0, K_PAD - K_IM2COL)))  # (B_pad,256,32)

    # Conv weights with the BN scale folded in (bf16); shifts stay f32.
    s1, b1 = _fold_bn(params["bn1_gamma"], params["bn1_beta"],
                      params["bn1_mean"], params["bn1_var"], params["conv1_b"])
    w1 = params["conv1_w"].reshape(C_MID, K_IM2COL).T.astype(jnp.float32) * s1
    w1 = jnp.pad(w1, ((0, K_PAD - K_IM2COL), (0, 0))).astype(jnp.bfloat16)   # (32, 64)
    s2, b2 = _fold_bn(params["bn2_gamma"], params["bn2_beta"],
                      params["bn2_mean"], params["bn2_var"], params["conv2_b"])
    w2 = (params["conv2_w"].reshape(C_OUT, C_MID).T.astype(jnp.float32) * s2
          ).astype(jnp.bfloat16)                                             # (64, 32)

    # FC weight: fold torch's (C, H, W) flatten order in at trace time, laid
    # out class-major: wcat[p, c*32 + ch] = fc_w[c, ch*256 + p].
    wcat = (params["fc_w"].astype(jnp.float32)
            .reshape(NUM_CLASSES, C_OUT, HW).transpose(2, 0, 1)
            .reshape(HW, FC_COLS).astype(jnp.bfloat16))                      # (256, 320)
    e_mat = jnp.tile(jnp.eye(C_OUT, dtype=jnp.bfloat16), (1, NUM_CLASSES))   # (32, 320)
    rsel = jnp.repeat(jnp.eye(NUM_CLASSES, dtype=jnp.float32), C_OUT, axis=0)
    rsel = jnp.pad(rsel, ((0, 0), (0, OUT_PAD - NUM_CLASSES)))               # (320, 128)
    bfc = jnp.zeros((1, OUT_PAD), jnp.float32).at[0, :NUM_CLASSES].set(
        params["fc_b"].astype(jnp.float32))
    # Block-diagonal ones matrix: per-image position reduction on the MXU.
    bd = jnp.repeat(jnp.eye(TB, dtype=jnp.float32), HW, axis=1)              # (TB, TB*256)

    flops = (NB * 2 * TB * HW * (K_PAD * C_MID + C_MID * C_OUT + C_OUT * FC_COLS)
             + NB * 2 * TB * (TB * HW) * FC_COLS
             + NB * 2 * TB * FC_COLS * OUT_PAD)
    bytes_accessed = (2 * patches.size
                      + 2 * (w1.size + w2.size + e_mat.size + wcat.size)
                      + 4 * (b1.size + b2.size + bd.size + rsel.size + bfc.size)
                      + 4 * NB * TB * OUT_PAD)

    out = pl.pallas_call(
        _fused_kernel,
        out_shape=jax.ShapeDtypeStruct((NB, TB, OUT_PAD), jnp.float32),
        grid=(NB,),
        in_specs=[
            pl.BlockSpec((TB, HW, K_PAD), lambda b: (b, 0, 0)),
            pl.BlockSpec((K_PAD, C_MID), lambda b: (0, 0)),
            pl.BlockSpec((1, C_MID), lambda b: (0, 0)),
            pl.BlockSpec((C_MID, C_OUT), lambda b: (0, 0)),
            pl.BlockSpec((1, C_OUT), lambda b: (0, 0)),
            pl.BlockSpec((C_OUT, FC_COLS), lambda b: (0, 0)),
            pl.BlockSpec((HW, FC_COLS), lambda b: (0, 0)),
            pl.BlockSpec((TB, TB * HW), lambda b: (0, 0)),
            pl.BlockSpec((FC_COLS, OUT_PAD), lambda b: (0, 0)),
            pl.BlockSpec((1, OUT_PAD), lambda b: (0, 0)),
        ],
        out_specs=pl.BlockSpec((1, TB, OUT_PAD), lambda b: (b, 0, 0)),
        compiler_params=pltpu.CompilerParams(
            dimension_semantics=("parallel",),
            allow_input_fusion=[True] + [False] * 9,
        ),
        cost_estimate=pl.CostEstimate(flops=int(flops), transcendentals=0,
                                      bytes_accessed=int(bytes_accessed)),
    )(patches, w1, b1, w2, b2, e_mat, wcat, bd, rsel, bfc)

    return out.reshape(B_pad, OUT_PAD)[:B, :NUM_CLASSES]


# ----------------------- Pure-JAX reference (check) ------------------------ #

def reference_forward(x, params):
    def bn(y, g, bta, m, v):
        return (y - m[None, :, None, None]) / jnp.sqrt(v[None, :, None, None] + BN_EPS) \
               * g[None, :, None, None] + bta[None, :, None, None]

    y = jax.lax.conv_general_dilated(
        x, params["conv1_w"], (1, 1), ((1, 1), (1, 1)),
        dimension_numbers=("NCHW", "OIHW", "NCHW"))
    y = y + params["conv1_b"][None, :, None, None]
    y = jnp.maximum(bn(y, params["bn1_gamma"], params["bn1_beta"],
                       params["bn1_mean"], params["bn1_var"]), 0.0)

    y = jax.lax.conv_general_dilated(
        y, params["conv2_w"], (1, 1), ((0, 0), (0, 0)),
        dimension_numbers=("NCHW", "OIHW", "NCHW"))
    y = y + params["conv2_b"][None, :, None, None]
    y = jnp.maximum(bn(y, params["bn2_gamma"], params["bn2_beta"],
                       params["bn2_mean"], params["bn2_var"]), 0.0)

    flat = y.reshape(y.shape[0], -1)
    return flat @ params["fc_w"].T + params["fc_b"]


# --------------------------------- Main ------------------------------------ #

def make_params(key):
    ks = jax.random.split(key, 16)
    return {
        "conv1_w": jax.random.normal(ks[0], (C_MID, C_IN, K, K), jnp.float32) * 0.05,
        "conv1_b": jax.random.normal(ks[1], (C_MID,), jnp.float32) * 0.05,
        "bn1_gamma": 1.0 + 0.1 * jax.random.normal(ks[2], (C_MID,), jnp.float32),
        "bn1_beta": 0.1 * jax.random.normal(ks[3], (C_MID,), jnp.float32),
        "bn1_mean": 0.1 * jax.random.normal(ks[4], (C_MID,), jnp.float32),
        "bn1_var": jax.random.uniform(ks[5], (C_MID,), jnp.float32, 0.5, 1.5),
        "conv2_w": jax.random.normal(ks[6], (C_OUT, C_MID, 1, 1), jnp.float32) * 0.05,
        "conv2_b": jax.random.normal(ks[7], (C_OUT,), jnp.float32) * 0.05,
        "bn2_gamma": 1.0 + 0.1 * jax.random.normal(ks[8], (C_OUT,), jnp.float32),
        "bn2_beta": 0.1 * jax.random.normal(ks[9], (C_OUT,), jnp.float32),
        "bn2_mean": 0.1 * jax.random.normal(ks[10], (C_OUT,), jnp.float32),
        "bn2_var": jax.random.uniform(ks[11], (C_OUT,), jnp.float32, 0.5, 1.5),
        "fc_w": jax.random.normal(ks[12], (NUM_CLASSES, C_OUT * H * W), jnp.float32) * 0.01,
        "fc_b": jax.random.normal(ks[13], (NUM_CLASSES,), jnp.float32) * 0.01,
    }


if __name__ == "__main__":
    key = jax.random.PRNGKey(0)
    kx, kp = jax.random.split(key)
    params = make_params(kp)

    # B=2 is the canonical small test; B=5 also exercises batch tiling (TB=2)
    # plus the batch-padding path.
    for B in (2, 5):
        x = jax.random.normal(jax.random.fold_in(kx, B), (B, C_IN, H, W), jnp.float32)
        out = jax.block_until_ready(svtr_compact_forward(x, params))
        ref = jax.block_until_ready(reference_forward(x, params))
        assert out.shape == (B, NUM_CLASSES), out.shape
        # bf16 input feed (native MXU path) vs. the f32 XLA reference: logits
        # are O(0.1), observed diffs are ~1e-3-level, so use a slightly wider
        # atol than pure-f32 would need.
        np.testing.assert_allclose(np.asarray(out), np.asarray(ref),
                                   rtol=1e-3, atol=3e-3)
    print("KERNEL_OK")
</pallas_src>

<mosaic_0001>
module attributes {stable_mosaic.version = 11 : i64} {
  func.func @_fused_kernel(%arg0: i32, %arg1: memref<1x256x32xbf16, #tpu.memory_space<vmem>>, %arg2: memref<32x64xbf16, #tpu.memory_space<vmem>>, %arg3: memref<1x64xf32, #tpu.memory_space<vmem>>, %arg4: memref<64x32xbf16, #tpu.memory_space<vmem>>, %arg5: memref<1x32xf32, #tpu.memory_space<vmem>>, %arg6: memref<32x320xbf16, #tpu.memory_space<vmem>>, %arg7: memref<256x320xbf16, #tpu.memory_space<vmem>>, %arg8: memref<1x256xf32, #tpu.memory_space<vmem>>, %arg9: memref<320x128xf32, #tpu.memory_space<vmem>>, %arg10: memref<1x128xf32, #tpu.memory_space<vmem>>, %arg11: memref<1x1x128xf32, #tpu.memory_space<vmem>>) attributes {dimension_semantics = [#tpu.dimension_semantics<parallel>], iteration_bounds = array<i64: 2>, scalar_prefetch = 0 : i64, scratch_operands = 0 : i64, tpu.core_type = #tpu.core_type<tc>, window_params = [{transform_indices = @transform_0, window_bounds = array<i64: 1, 256, 32>}, {pipeline_mode = #tpu.pipeline_mode<synchronous>, transform_indices = @transform_1, window_bounds = array<i64: 32, 64>}, {pipeline_mode = #tpu.pipeline_mode<synchronous>, transform_indices = @transform_2, window_bounds = array<i64: 1, 64>}, {pipeline_mode = #tpu.pipeline_mode<synchronous>, transform_indices = @transform_3, window_bounds = array<i64: 64, 32>}, {pipeline_mode = #tpu.pipeline_mode<synchronous>, transform_indices = @transform_4, window_bounds = array<i64: 1, 32>}, {pipeline_mode = #tpu.pipeline_mode<synchronous>, transform_indices = @transform_5, window_bounds = array<i64: 32, 320>}, {pipeline_mode = #tpu.pipeline_mode<synchronous>, transform_indices = @transform_6, window_bounds = array<i64: 256, 320>}, {pipeline_mode = #tpu.pipeline_mode<synchronous>, transform_indices = @transform_7, window_bounds = array<i64: 1, 256>}, {pipeline_mode = #tpu.pipeline_mode<synchronous>, transform_indices = @transform_8, window_bounds = array<i64: 320, 128>}, {pipeline_mode = #tpu.pipeline_mode<synchronous>, transform_indices = @transform_9, window_bounds = array<i64: 1, 128>}, {transform_indices = @transform_10, window_bounds = array<i64: 1, 1, 128>}]} {
    %c0 = arith.constant 0 : index
    %c0_0 = arith.constant 0 : index
    %c0_1 = arith.constant 0 : index
    %0 = vector.load %arg1[%c0, %c0_0, %c0_1] : memref<1x256x32xbf16, #tpu.memory_space<vmem>>, vector<1x256x32xbf16>
    %1 = vector.shape_cast %0 : vector<1x256x32xbf16> to vector<256x32xbf16>
    %c0_2 = arith.constant 0 : index
    %c0_3 = arith.constant 0 : index
    %2 = vector.load %arg2[%c0_2, %c0_3] : memref<32x64xbf16, #tpu.memory_space<vmem>>, vector<32x64xbf16>
    %cst = arith.constant dense<0.000000e+00> : vector<256x64xf32>
    %3 = tpu.matmul %1, %2, %cst {dimension_numbers = #tpu.dot_dimension_numbers<[1], [0], [0], [1], [0, 0, 1, 1], [], []>} : vector<256x32xbf16>, vector<32x64xbf16>, vector<256x64xf32> -> vector<256x64xf32>
    %c0_4 = arith.constant 0 : index
    %c0_5 = arith.constant 0 : index
    %4 = vector.load %arg3[%c0_4, %c0_5] : memref<1x64xf32, #tpu.memory_space<vmem>>, vector<1x64xf32>
    %5 = vector.broadcast %4 : vector<1x64xf32> to vector<256x64xf32>
    %6 = arith.addf %3, %5 : vector<256x64xf32>
    %cst_6 = arith.constant 0.000000e+00 : f32
    %7 = vector.broadcast %cst_6 : f32 to vector<256x64xf32>
    %8 = arith.maximumf %6, %7 : vector<256x64xf32>
    %9 = arith.truncf %8 : vector<256x64xf32> to vector<256x64xbf16>
    %c0_7 = arith.constant 0 : index
    %c0_8 = arith.constant 0 : index
    %10 = vector.load %arg4[%c0_7, %c0_8] : memref<64x32xbf16, #tpu.memory_space<vmem>>, vector<64x32xbf16>
    %cst_9 = arith.constant dense<0.000000e+00> : vector<256x32xf32>
    %11 = tpu.matmul %9, %10, %cst_9 {dimension_numbers = #tpu.dot_dimension_numbers<[1], [0], [0], [1], [0, 0, 1, 1], [], []>} : vector<256x64xbf16>, vector<64x32xbf16>, vector<256x32xf32> -> vector<256x32xf32>
    %c0_10 = arith.constant 0 : index
    %c0_11 = arith.constant 0 : index
    %12 = vector.load %arg5[%c0_10, %c0_11] : memref<1x32xf32, #tpu.memory_space<vmem>>, vector<1x32xf32>
    %13 = vector.broadcast %12 : vector<1x32xf32> to vector<256x32xf32>
    %14 = arith.addf %11, %13 : vector<256x32xf32>
    %cst_12 = arith.constant 0.000000e+00 : f32
    %15 = vector.broadcast %cst_12 : f32 to vector<256x32xf32>
    %16 = arith.maximumf %14, %15 : vector<256x32xf32>
    %17 = arith.truncf %16 : vector<256x32xf32> to vector<256x32xbf16>
    %c0_13 = arith.constant 0 : index
    %c0_14 = arith.constant 0 : index
    %18 = vector.load %arg6[%c0_13, %c0_14] : memref<32x320xbf16, #tpu.memory_space<vmem>>, vector<32x320xbf16>
    %cst_15 = arith.constant dense<0.000000e+00> : vector<256x320xf32>
    %19 = tpu.matmul %17, %18, %cst_15 {dimension_numbers = #tpu.dot_dimension_numbers<[1], [0], [0], [1], [0, 0, 1, 1], [], []>} : vector<256x32xbf16>, vector<32x320xbf16>, vector<256x320xf32> -> vector<256x320xf32>
    %20 = vector.shape_cast %19 : vector<256x320xf32> to vector<1x256x320xf32>
    %c0_16 = arith.constant 0 : index
    %c0_17 = arith.constant 0 : index
    %21 = vector.load %arg7[%c0_16, %c0_17] : memref<256x320xbf16, #tpu.memory_space<vmem>>, vector<256x320xbf16>
    %22 = vector.shape_cast %21 : vector<256x320xbf16> to vector<1x256x320xbf16>
    %23 = arith.extf %22 : vector<1x256x320xbf16> to vector<1x256x320xf32>
    %24 = arith.mulf %20, %23 : vector<1x256x320xf32>
    %25 = vector.shape_cast %24 : vector<1x256x320xf32> to vector<256x320xf32>
    %c0_18 = arith.constant 0 : index
    %c0_19 = arith.constant 0 : index
    %26 = vector.load %arg8[%c0_18, %c0_19] : memref<1x256xf32, #tpu.memory_space<vmem>>, vector<1x256xf32>
    %cst_20 = arith.constant dense<0.000000e+00> : vector<1x320xf32>
    %27 = tpu.matmul %26, %25, %cst_20 {dimension_numbers = #tpu.dot_dimension_numbers<[1], [0], [0], [1], [0, 0, 1, 1], [], []>} : vector<1x256xf32>, vector<256x320xf32>, vector<1x320xf32> -> vector<1x320xf32>
    %c0_21 = arith.constant 0 : index
    %c0_22 = arith.constant 0 : index
    %28 = vector.load %arg9[%c0_21, %c0_22] : memref<320x128xf32, #tpu.memory_space<vmem>>, vector<320x128xf32>
    %cst_23 = arith.constant dense<0.000000e+00> : vector<1x128xf32>
    %29 = tpu.matmul %27, %28, %cst_23 {dimension_numbers = #tpu.dot_dimension_numbers<[1], [0], [0], [1], [0, 0, 1, 1], [], []>} : vector<1x320xf32>, vector<320x128xf32>, vector<1x128xf32> -> vector<1x128xf32>
    %c0_24 = arith.constant 0 : index
    %c0_25 = arith.constant 0 : index
    %30 = vector.load %arg10[%c0_24, %c0_25] : memref<1x128xf32, #tpu.memory_space<vmem>>, vector<1x128xf32>
    %31 = arith.addf %29, %30 : vector<1x128xf32>
    %c0_26 = arith.constant 0 : index
    %c0_27 = arith.constant 0 : index
    %c0_28 = arith.constant 0 : index
    %32 = vector.load %arg11[%c0_26, %c0_27, %c0_28] : memref<1x1x128xf32, #tpu.memory_space<vmem>>, vector<1x1x128xf32>
    %33 = vector.shape_cast %32 : vector<1x1x128xf32> to vector<1x128xf32>
    %34 = vector.shape_cast %31 : vector<1x128xf32> to vector<1x1x128xf32>
    tpu.vector_store %arg11[%c0_26, %c0_27, %c0_28], %34 {strides = array<i32>} : memref<1x1x128xf32, #tpu.memory_space<vmem>>, vector<1x1x128xf32>,
    return
  }
  func.func @transform_0(%arg0: i32) -> (i32, i32, i32) {
    %c0_i32 = arith.constant 0 : i32
    %c0_i32_0 = arith.constant 0 : i32
    %c0_i32_1 = arith.constant 0 : i32
    return %arg0, %c0_i32, %c0_i32_0 : i32, i32, i32
  }
  func.func @transform_1(%arg0: i32) -> (i32, i32) {
    %c0_i32 = arith.constant 0 : i32
    %c0_i32_0 = arith.constant 0 : i32
    %c0_i32_1 = arith.constant 0 : i32
    return %c0_i32, %c0_i32_0 : i32, i32
  }
  func.func @transform_2(%arg0: i32) -> (i32, i32) {
    %c0_i32 = arith.constant 0 : i32
    %c0_i32_0 = arith.constant 0 : i32
    %c0_i32_1 = arith.constant 0 : i32
    return %c0_i32, %c0_i32_0 : i32, i32
  }
  func.func @transform_3(%arg0: i32) -> (i32, i32) {
    %c0_i32 = arith.constant 0 : i32
    %c0_i32_0 = arith.constant 0 : i32
    %c0_i32_1 = arith.constant 0 : i32
    return %c0_i32, %c0_i32_0 : i32, i32
  }
  func.func @transform_4(%arg0: i32) -> (i32, i32) {
    %c0_i32 = arith.constant 0 : i32
    %c0_i32_0 = arith.constant 0 : i32
    %c0_i32_1 = arith.constant 0 : i32
    return %c0_i32, %c0_i32_0 : i32, i32
  }
  func.func @transform_5(%arg0: i32) -> (i32, i32) {
    %c0_i32 = arith.constant 0 : i32
    %c0_i32_0 = arith.constant 0 : i32
    %c0_i32_1 = arith.constant 0 : i32
    return %c0_i32, %c0_i32_0 : i32, i32
  }
  func.func @transform_6(%arg0: i32) -> (i32, i32) {
    %c0_i32 = arith.constant 0 : i32
    %c0_i32_0 = arith.constant 0 : i32
    %c0_i32_1 = arith.constant 0 : i32
    return %c0_i32, %c0_i32_0 : i32, i32
  }
  func.func @transform_7(%arg0: i32) -> (i32, i32) {
    %c0_i32 = arith.constant 0 : i32
    %c0_i32_0 = arith.constant 0 : i32
    %c0_i32_1 = arith.constant 0 : i32
    return %c0_i32, %c0_i32_0 : i32, i32
  }
  func.func @transform_8(%arg0: i32) -> (i32, i32) {
    %c0_i32 = arith.constant 0 : i32
    %c0_i32_0 = arith.constant 0 : i32
    %c0_i32_1 = arith.constant 0 : i32
    return %c0_i32, %c0_i32_0 : i32, i32
  }
  func.func @transform_9(%arg0: i32) -> (i32, i32) {
    %c0_i32 = arith.constant 0 : i32
    %c0_i32_0 = arith.constant 0 : i32
    %c0_i32_1 = arith.constant 0 : i32
    return %c0_i32, %c0_i32_0 : i32, i32
  }
  func.func @transform_10(%arg0: i32) -> (i32, i32, i32) {
    %c0_i32 = arith.constant 0 : i32
    %c0_i32_0 = arith.constant 0 : i32
    %c0_i32_1 = arith.constant 0 : i32
    return %arg0, %c0_i32, %c0_i32_0 : i32, i32, i32
  }
}

</mosaic_0001>

<bundles_post_ra>
// kernel: tpu_custom_call.1
= control target key start
LH: loop header
LB: loop body
LE: loop exit
PB: predicated region body
PF: predicated region fallthrough
CT: control target
= control target key end

     0   :  { %15 = vsyncpa [#allocation3], 0  ;;  %s3599_s0 = inlined_call_operand.vmem [shape: bf16[2,256,32], index: 0, kind: input, shape index: {}]   ;;  %s3600_s1 = inlined_call_operand.vmem [shape: bf16[32,64], index: 1, kind: input, shape index: {}]   ;;  %s3601_s2 = inlined_call_operand.vmem [shape: f32[1,64], index: 2, kind: input, shape index: {}]   ;;  %s3602_s3 = inlined_call_operand.vmem [shape: bf16[64,32], index: 3, kind: input, shape index: {}]   ;;  %s3603_s4 = inlined_call_operand.vmem [shape: f32[1,32], index: 4, kind: input, shape index: {}]   ;;  %s3604_s5 = inlined_call_operand.vmem [shape: bf16[32,320], index: 5, kind: input, shape index: {}]   ;;  %s3605_s6 = inlined_call_operand.vmem [shape: bf16[256,320], index: 6, kind: input, shape index: {}]   ;;  %s3606_s7 = inlined_call_operand.vmem [shape: f32[1,256], index: 7, kind: input, shape index: {}]   ;;  %s3607_s8 = inlined_call_operand.vmem [shape: f32[320,128], index: 8, kind: input, shape index: {}]   ;;  %s3608_s9 = inlined_call_operand.vmem [shape: f32[1,128], index: 9, kind: input, shape index: {}]   ;;  %s3609_s10 = inlined_call_operand.hbm [shape: f32[2,1,128], index: 10, kind: output, shape index: {}]  }
   0x1   :  { %17 = vsyncpa [#allocation3 + $0x1], 0  ;;  %s2860_s13 = smov 0   ;;  %s2862_s14 = smov 0  }
   0x2   :  { %s2864_s15 = smov 0   ;;  %s2866_s16 = smov 0  }
   0x3 LB: > { %s2881_s17 = sadd.s32 4294967295, %s2798_s16   ;;  %s2152_s18 = sadd.s32 4294967294, %s2798_s16   ;;  %s2798_s16 = sphi %s2866_s16, %s3624_s16   ;;  %s2794_s15 = sphi %s2864_s15, %s3623_s15   ;;  %s2790_s14 = sphi %s2862_s14, %s3622_s14   ;;  %s2786_s13 = sphi %s2860_s13, %s3621_s13  }
   0x4   : > { %s2885_s19 = sadd.s32 1, %s2798_s16   ;;  %s245_s20 = sadd.s32 1, %s2794_s15 }
   0x5   : > { %s242_s21 = ssub.s32 %s2798_s16, %s2885_s19  ;;  %p255_p0 = scmp.ne.s32.totalorder %s2794_s15, %s2790_s14 }
   0x6   : > { %p243_p1 = scmp.eq.s32.totalorder %s242_s21, 0  ;;  %p256_p2 = scmp.eq.s32.totalorder %s2881_s17, 1 }
   0x7   : > { %p261_p3 = scmp.ne.s32.totalorder %s2790_s14, %s2786_s13  ;;  %p262_p4 = scmp.eq.s32.totalorder %s2152_s18, 1 }
   0x8   : > { %s2896_s22 = scalar_select %p243_p1, %s2794_s15, %s245_s20  }
   0x9   : > { %p2898_p5 = por %p256_p2, %p255_p0  ;;  %p2902_p6 = por %p262_p4, %p261_p3 }
   0xa   : > { %p2155_p7 = scmp.ge.s32.totalorder %s2798_s16, 1  ;;  %p315_p8 = scmp.lt.s32.totalorder %s2798_s16, 3 }
   0xc   : > { %p316_p9 = pnand %p2155_p7, %p315_p8 }
   0xd   : > { %v2706_v0 = vld [vmem:[%s3600_s1] sm:$0xff] (!%p316_p9)   ;;  %p352_p10 = scmp.lt.s32.totalorder (!%p316_p9), %s2881_s17, 1  ;;  %v2707_v1 = vld [vmem:[%s3600_s1 + $0x8] sm:$0xff] (!%p316_p9)   ;;  %vm493_vm0 = vcmask (!%p316_p9), 261120   ;;  %v2726_v20 = vld [vmem:[%s3602_s3 + $0x10] sm:$0xff] (!%p316_p9)   ;;  %vm790_vm1 = vcmask (!%p316_p9), 523264  }
   0xe   : > { %319 = sbr.rel (%p316_p9) target bundleno = 1288 (0x508), region = 60  ;;  %2392 = vmatprep.subr.bf16.mxu0 (!%p316_p9), %v2706_v0  ;;  %v2724_v2 = vld [vmem:[%s3602_s3] sm:$0xff] (!%p316_p9)   ;;  %v2725_v3 = vld [vmem:[%s3602_s3 + $0x8] sm:$0xff] (!%p316_p9)   ;;  %v2727_v21 = vld [vmem:[%s3602_s3 + $0x18] sm:$0xff] (!%p316_p9)   ;;  %vm2802_vm2 = vmmov (!%p316_p9), 0   ;;  %s350_s27 = sand.u32 (!%p316_p9), 1, %s2790_s14  }
   0xf   : > { %2393 = vmatpush3.bf16.msra.mxu0 (!%p316_p9), %v2706_v0  ;;  %2428 = vmatprep.subr.bf16.mxu1 (!%p316_p9), %v2724_v2  ;;  %v2728_v22 = vld [vmem:[%s3604_s5] ss:$12 sps:$4 sm:$0xff] (!%p316_p9)   ;;  %v2730_v23 = vld [vmem:[%s3604_s5 + $0x4] ss:$12 sps:$4 sm:$0xff] (!%p316_p9)   ;;  %v2733_v24 = vld [vmem:[%s3604_s5 + $0x1c] ss:$12 sps:$4 sm:$0xff] (!%p316_p9)  }
  0x10   : > { %2394 = vmatprep.subr.bf16.mxu0 (!%p316_p9), %v2707_v1  ;;  %2429 = vmatpush3.bf16.msra.mxu1 (!%p316_p9), %v2724_v2  ;;  %v2731_v25 = vld [vmem:[%s3604_s5 + $0x18] ss:$12 sps:$4 sm:$0xff] (!%p316_p9)   ;;  %v2980_v26 = vld [vmem:[%s3601_s2] ss:$0 sm:$0xff] (!%p316_p9)  ;;  %s2253_s30 = sshll.u32 (!%p316_p9), %s2881_s17, 4  ;;  %s351_s11 = scalar_lea.vmem (!%p316_p9), [#allocation2], %s350_s27 }
  0x11   : > { %2430 = vmatprep.subr.bf16.mxu1 (!%p316_p9), %v2725_v3  ;;  %s2097_s12 = sshll.u32 (!%p316_p9), %s351_s11, 4  ;;  %s3557_s21 = scalar_lea.hbm (!%p316_p9), %s3609_s10, %s2253_s30  ;;  %s3559_s12 = int_to_ptr.vmem [resolvable:$true] %s2097_s12 }
  0x12   : > { %s2085_s25 = scalar_lea.sflag (!%p316_p9), [#allocation3], %s350_s27 }
  0x13   : > { %2395 = vmatpush3.bf16.msra.mxu0 (!%p316_p9), %v2707_v1 }
  0x14   : > { %2431 = vmatpush3.bf16.msra.mxu1 (!%p316_p9), %v2725_v3  ;;  %1136 = vmatprep.subr.bf16.mxu0 (!%p316_p9), %v2730_v23 }
  0x15   : > { %s353_s29 = scalar_select %p352_p10, %s2881_s17, 1  ;;  %2432 = vmatprep.subr.bf16.mxu1 %v2726_v20 }
  0x16   : > { %s2804_s17 = smov [#allocation2]  }
  0x17   : > { %s2256_s20 = sshll.u32 %s353_s29, 7  ;;  %s2740_s28 = sshll.u32 %s2804_s17, 4  ;;  %s2741_s28 = int_to_ptr.vmem [resolvable:$false] %s2740_s28 }
  0x18   : > { %s2925_s26 = scalar_lea.vmem %s3599_s0, %s2256_s20  ;;  %2433 = vmatpush3.bf16.msra.mxu1 %v2726_v20  ;;  %s2742_s29 = scalar_lea.vmem %s2741_s28, 32 }
  0x19   : > { %v2708_v4 = vld [vmem:[%s2925_s26] sm:$0xff]   ;;  %v2709_v5 = vld [vmem:[%s2925_s26 + $0x8] sm:$0xff]   ;;  %v2710_v6 = vld [vmem:[%s2925_s26 + $0x10] sm:$0xff]   ;;  %2434 = vmatprep.subr.bf16.mxu1 %v2727_v21  ;;  %p2743_p0 = scmp.lt.s32.totalorder %s3559_s12, %s2741_s28 }
  0x1a   : > { %2396 = vmatprep.mubr.msk.bf16.mxu0 %vm493_vm0, %v2708_v4  ;;  %v2711_v7 = vld [vmem:[%s2925_s26 + $0x18] sm:$0xff]   ;;  %v2712_v8 = vld [vmem:[%s2925_s26 + $0x20] sm:$0xff]   ;;  %v2713_v9 = vld [vmem:[%s2925_s26 + $0x28] sm:$0xff]  }
  0x1b   : > { %2397 = vmatmul.mubr.msk.bf16.vlgmr.msra.gmra.mrb[0].mxu0 %vm493_vm0, %v2709_v5  ;;  %v2714_v10 = vld [vmem:[%s2925_s26 + $0x30] sm:$0xff]   ;;  %v2715_v11 = vld [vmem:[%s2925_s26 + $0x38] sm:$0xff]   ;;  %v2716_v12 = vld [vmem:[%s2925_s26 + $0x40] sm:$0xff]  }
  0x1c   : > { %2400 = vmatprep.mubr.msk.bf16.mxu0 %vm493_vm0, %v2710_v6  ;;  %v2717_v13 = vld [vmem:[%s2925_s26 + $0x48] sm:$0xff]   ;;  %v2718_v14 = vld [vmem:[%s2925_s26 + $0x50] sm:$0xff]   ;;  %v2719_v15 = vld [vmem:[%s2925_s26 + $0x58] sm:$0xff]   ;;  %2435 = vmatpush3.bf16.msra.mxu1 %v2727_v21 }
  0x1d   : > { %v2720_v16 = vld [vmem:[%s2925_s26 + $0x60] sm:$0xff]   ;;  %v2721_v17 = vld [vmem:[%s2925_s26 + $0x68] sm:$0xff]   ;;  %v2722_v18 = vld [vmem:[%s2925_s26 + $0x70] sm:$0xff]   ;;  %1137 = vmatpush1.bf16.msra.mxu0 %v2728_v22 }
  0x1e   : > { %v2723_v19 = vld [vmem:[%s2925_s26 + $0x78] sm:$0xff]   ;;  %1138 = vmatprep.subr.bf16.mxu0 %v2733_v24  ;;  %s2736_s26 = scalar_lea.vmem %s3559_s12, 16 }
  0x1f   : > { %p2737_p11 = scmp.ne.s32.totalorder %s3559_s12, %s2736_s26  ;;  %p2744_p1 = scmp.lt.s32.totalorder %s2742_s29, %s2736_s26 }
  0x21   : > { %1139 = vmatpush1.bf16.msra.mxu0 %v2731_v25  ;;  %p2738_p12 = pnand %p2737_p11, %p2898_p5  ;;  %p2745_p2 = por %p2744_p1, %p2743_p0 }
  0x23   : > { %2401 = vmatmul.mubr.msk.bf16.gmra.mrb[4].mxu0 %vm493_vm0, %v2711_v7  ;;  %p2739_p13 = pneg %p2738_p12 }
  0x24   : > { %2404 = vmatprep.mubr.msk.bf16.mxu0 %vm493_vm0, %v2712_v8 }
  0x25   : > { %p2746_p3 = pnand %p2745_p2, %p2739_p13 }
  0x2b   : > { %2405 = vmatmul.mubr.msk.bf16.gmra.mrb[8].mxu0 %vm493_vm0, %v2713_v9 }
  0x2c   : > { %2408 = vmatprep.mubr.msk.bf16.mxu0 %vm493_vm0, %v2714_v10 }
  0x33   : > { %2409 = vmatmul.mubr.msk.bf16.gmra.mrb[12].mxu0 %vm493_vm0, %v2715_v11 }
  0x34   : > { %2412 = vmatprep.mubr.msk.bf16.mxu0 %vm493_vm0, %v2716_v12 }
  0x3b   : > { %2413 = vmatmul.mubr.msk.bf16.gmra.mrb[16].mxu0 %vm493_vm0, %v2717_v13 }
  0x3c   : > { %2416 = vmatprep.mubr.msk.bf16.mxu0 %vm493_vm0, %v2718_v14 }
  0x43   : > { %2417 = vmatmul.mubr.msk.bf16.gmra.mrb[20].mxu0 %vm493_vm0, %v2719_v15 }
  0x44   : > { %2420 = vmatprep.mubr.msk.bf16.mxu0 %vm493_vm0, %v2720_v16 }
  0x4b   : > { %2421 = vmatmul.mubr.msk.bf16.gmra.mrb[24].mxu0 %vm493_vm0, %v2721_v17 }
  0x4c   : > { %2424 = vmatprep.mubr.msk.bf16.mxu0 %vm493_vm0, %v2722_v18 }
  0x53   : > { %2425 = vmatmul.mubr.msk.bf16.gmra.mrb[28].mxu0 %vm493_vm0, %v2723_v19 }
  0xee   : > { %v2398_v27 = vpop.f32.mrb[0].mxu0 }
  0xef   : > { %v585_v28 = vadd.f32 %v2398_v27, %v2980_v26  ;;  %v576_v29 = vpop.f32.mrb[1].mxu0 }
  0xf0   : > { %v577_v30 = vadd.f32 %v2980_v26, %v576_v29  ;;  %v2399_v31 = vpop.f32.mrb[2].mxu0 }
  0xf1   : > { %v588_v32 = vadd.f32 %v2399_v31, %v2980_v26  ;;  %v579_v33 = vpop.f32.mrb[3].mxu0  ;;  %v705_v35 = vmax.f32 %v585_v28, 0.0 }
  0xf2   : > { %v580_v34 = vadd.f32 %v2980_v26, %v579_v33  ;;  %v703_v37 = vmax.f32 %v577_v30, 0.0 }
  0xf3   : > { %v706_v36 = vmax.f32 %v588_v32, 0.0 }
  0xf4   : > { %v704_v38 = vmax.f32 %v580_v34, 0.0 }
  0xf5   : > { %v736_v39 = vpack.c.bf16 %v706_v36, %v705_v35 }
  0xf6   : > { %v2402_v40 = vpop.f32.mrb[4].mxu0  ;;  %v735_v41 = vpack.c.bf16 %v704_v38, %v703_v37 }
  0xf7   : > { %v601_v42 = vadd.f32 %v2402_v40, %v2980_v26  ;;  %v592_v43 = vpop.f32.mrb[5].mxu0 }
  0xf8   : > { %v593_v44 = vadd.f32 %v2980_v26, %v592_v43  ;;  %v2403_v45 = vpop.f32.mrb[6].mxu0  ;;  %2436 = vmatprep.mubr.msk.bf16.mxu1 %vm790_vm1, %v735_v41 }
  0xf9   : > { %v709_v46 = vmax.f32 %v601_v42, 0.0  ;;  %v604_v47 = vadd.f32 %v2403_v45, %v2980_v26  ;;  %v595_v48 = vpop.f32.mrb[7].mxu0  ;;  %2437 = vmatmul.mubr.msk.bf16.vlgmr.msra.gmra.mrb[0].mxu1 %vm790_vm1, %v736_v39 }
  0xfa   : > { %v707_v49 = vmax.f32 %v593_v44, 0.0  ;;  %v596_v50 = vadd.f32 %v2980_v26, %v595_v48 }
  0xfb   : > { %v710_v51 = vmax.f32 %v604_v47, 0.0 }
  0xfc   : > { %v708_v52 = vmax.f32 %v596_v50, 0.0 }
  0xfd   : > { %v738_v53 = vpack.c.bf16 %v710_v51, %v709_v46 }
  0xfe   : > { %v737_v54 = vpack.c.bf16 %v708_v52, %v707_v49  ;;  %v2406_v55 = vpop.f32.mrb[8].mxu0 }
  0xff   : > { %v617_v56 = vadd.f32 %v2406_v55, %v2980_v26  ;;  %v608_v57 = vpop.f32.mrb[9].mxu0 }
 0x100   : > { %2440 = vmatprep.mubr.msk.bf16.mxu1 %vm790_vm1, %v737_v54  ;;  %v609_v58 = vadd.f32 %v2980_v26, %v608_v57  ;;  %v2407_v59 = vpop.f32.mrb[10].mxu0 }
 0x101   : > { %2441 = vmatmul.mubr.msk.bf16.gmra.mrb[4].mxu1 %vm790_vm1, %v738_v53  ;;  %v713_v60 = vmax.f32 %v617_v56, 0.0  ;;  %v620_v61 = vadd.f32 %v2407_v59, %v2980_v26  ;;  %v611_v62 = vpop.f32.mrb[11].mxu0 }
 0x102   : > { %v711_v63 = vmax.f32 %v609_v58, 0.0  ;;  %v612_v0 = vadd.f32 %v2980_v26, %v611_v62 }
 0x103   : > { %v714_v1 = vmax.f32 %v620_v61, 0.0 }
 0x104   : > { %v712_v2 = vmax.f32 %v612_v0, 0.0 }
 0x105   : > { %v740_v3 = vpack.c.bf16 %v714_v1, %v713_v60 }
 0x106   : > { %v739_v4 = vpack.c.bf16 %v712_v2, %v711_v63  ;;  %v2410_v5 = vpop.f32.mrb[12].mxu0 }
 0x107   : > { %v633_v6 = vadd.f32 %v2410_v5, %v2980_v26  ;;  %v624_v7 = vpop.f32.mrb[13].mxu0 }
 0x108   : > { %2444 = vmatprep.mubr.msk.bf16.mxu1 %vm790_vm1, %v739_v4  ;;  %v625_v8 = vadd.f32 %v2980_v26, %v624_v7  ;;  %v2411_v9 = vpop.f32.mrb[14].mxu0 }
 0x109   : > { %2445 = vmatmul.mubr.msk.bf16.gmra.mrb[8].mxu1 %vm790_vm1, %v740_v3  ;;  %v717_v10 = vmax.f32 %v633_v6, 0.0  ;;  %v636_v11 = vadd.f32 %v2411_v9, %v2980_v26  ;;  %v627_v12 = vpop.f32.mrb[15].mxu0 }
 0x10a   : > { %v715_v13 = vmax.f32 %v625_v8, 0.0  ;;  %v628_v14 = vadd.f32 %v2980_v26, %v627_v12  ;;  %v2734_v12 = vld [vmem:[%s3604_s5 + $0x8] ss:$12 sps:$4 sm:$0xff]  }
 0x10b   : > { %v718_v15 = vmax.f32 %v636_v11, 0.0  ;;  %2468 = vmatprep.subr.bf16.mxu1 %v2734_v12 }
 0x10c   : > { %v716_v16 = vmax.f32 %v628_v14, 0.0  ;;  %2469 = vmatpush3.bf16.msra.mxu1 %v2734_v12  ;;  %v3040_v14 = vld [vmem:[%s3603_s4] ss:$0 sm:$0xff] }
 0x10d   : > { %v742_v17 = vpack.c.bf16 %v718_v15, %v717_v10 }
 0x10e   : > { %v741_v18 = vpack.c.bf16 %v716_v16, %v715_v13  ;;  %v2414_v19 = vpop.f32.mrb[16].mxu0  ;;  %v2735_v13 = vld [vmem:[%s3604_s5 + $0x20] ss:$12 sps:$4 sm:$0xff]  }
 0x10f   : > { %v649_v20 = vadd.f32 %v2414_v19, %v2980_v26  ;;  %v640_v21 = vpop.f32.mrb[17].mxu0  ;;  %2470 = vmatprep.subr.bf16.mxu1 %v2735_v13 }
 0x110   : > { %2448 = vmatprep.mubr.msk.bf16.mxu1 %vm790_vm1, %v741_v18  ;;  %v641_v22 = vadd.f32 %v2980_v26, %v640_v21  ;;  %v2415_v23 = vpop.f32.mrb[18].mxu0  ;;  %2471 = vmatpush3.bf16.msra.mxu1 %v2735_v13 }
 0x111   : > { %2449 = vmatmul.mubr.msk.bf16.gmra.mrb[12].mxu1 %vm790_vm1, %v742_v17  ;;  %v721_v24 = vmax.f32 %v649_v20, 0.0  ;;  %v652_v25 = vadd.f32 %v2415_v23, %v2980_v26  ;;  %v643_v27 = vpop.f32.mrb[19].mxu0 }
 0x112   : > { %v719_v28 = vmax.f32 %v641_v22, 0.0  ;;  %v644_v29 = vadd.f32 %v2980_v26, %v643_v27 }
 0x113   : > { %v722_v30 = vmax.f32 %v652_v25, 0.0 }
 0x114   : > { %v720_v31 = vmax.f32 %v644_v29, 0.0 }
 0x115   : > { %v744_v32 = vpack.c.bf16 %v722_v30, %v721_v24 }
 0x116   : > { %v743_v33 = vpack.c.bf16 %v720_v31, %v719_v28  ;;  %v2418_v34 = vpop.f32.mrb[20].mxu0 }
 0x117   : > { %v665_v35 = vadd.f32 %v2418_v34, %v2980_v26  ;;  %v656_v36 = vpop.f32.mrb[21].mxu0 }
 0x118   : > { %2452 = vmatprep.mubr.msk.bf16.mxu1 %vm790_vm1, %v743_v33  ;;  %v657_v37 = vadd.f32 %v2980_v26, %v656_v36  ;;  %v2419_v38 = vpop.f32.mrb[22].mxu0 }
 0x119   : > { %2453 = vmatmul.mubr.msk.bf16.gmra.mrb[16].mxu1 %vm790_vm1, %v744_v32  ;;  %v725_v39 = vmax.f32 %v665_v35, 0.0  ;;  %v668_v40 = vadd.f32 %v2419_v38, %v2980_v26  ;;  %v659_v41 = vpop.f32.mrb[23].mxu0 }
 0x11a   : > { %v723_v42 = vmax.f32 %v657_v37, 0.0  ;;  %v660_v43 = vadd.f32 %v2980_v26, %v659_v41 }
 0x11b   : > { %v726_v44 = vmax.f32 %v668_v40, 0.0 }
 0x11c   : > { %v724_v45 = vmax.f32 %v660_v43, 0.0 }
 0x11d   : > { %v746_v46 = vpack.c.bf16 %v726_v44, %v725_v39 }
 0x11e   : > { %v745_v47 = vpack.c.bf16 %v724_v45, %v723_v42  ;;  %v2422_v48 = vpop.f32.mrb[24].mxu0 }
 0x11f   : > { %v681_v49 = vadd.f32 %v2422_v48, %v2980_v26  ;;  %v672_v50 = vpop.f32.mrb[25].mxu0 }
 0x120   : > { %2456 = vmatprep.mubr.msk.bf16.mxu1 %vm790_vm1, %v745_v47  ;;  %v673_v51 = vadd.f32 %v2980_v26, %v672_v50  ;;  %v2423_v52 = vpop.f32.mrb[26].mxu0 }
 0x121   : > { %2457 = vmatmul.mubr.msk.bf16.gmra.mrb[20].mxu1 %vm790_vm1, %v746_v46  ;;  %v729_v53 = vmax.f32 %v681_v49, 0.0  ;;  %v684_v54 = vadd.f32 %v2423_v52, %v2980_v26  ;;  %v675_v55 = vpop.f32.mrb[27].mxu0 }
 0x122   : > { %v727_v56 = vmax.f32 %v673_v51, 0.0  ;;  %v676_v57 = vadd.f32 %v2980_v26, %v675_v55 }
 0x123   : > { %v730_v58 = vmax.f32 %v684_v54, 0.0 }
 0x124   : > { %v728_v59 = vmax.f32 %v676_v57, 0.0 }
 0x125   : > { %v748_v60 = vpack.c.bf16 %v730_v58, %v729_v53 }
 0x126   : > { %v747_v61 = vpack.c.bf16 %v728_v59, %v727_v56  ;;  %v2426_v62 = vpop.f32.mrb[28].mxu0 }
 0x127   : > { %v697_v63 = vadd.f32 %v2426_v62, %v2980_v26  ;;  %v688_v0 = vpop.f32.mrb[29].mxu0 }
 0x128   : > { %2460 = vmatprep.mubr.msk.bf16.mxu1 %vm790_vm1, %v747_v61  ;;  %v689_v1 = vadd.f32 %v2980_v26, %v688_v0  ;;  %v2427_v2 = vpop.f32.mrb[30].mxu0 }
 0x129   : > { %2461 = vmatmul.mubr.msk.bf16.gmra.mrb[24].mxu1 %vm790_vm1, %v748_v60  ;;  %v733_v3 = vmax.f32 %v697_v63, 0.0  ;;  %v700_v4 = vadd.f32 %v2427_v2, %v2980_v26  ;;  %v691_v5 = vpop.f32.mrb[31].mxu0 }
 0x12a   : > { %v731_v6 = vmax.f32 %v689_v1, 0.0  ;;  %v692_v7 = vadd.f32 %v2980_v26, %v691_v5  ;;  %v2800_v26 = vmov 0  }
 0x12b   : > { %v734_v8 = vmax.f32 %v700_v4, 0.0  ;;  %1168 = vmatprep.mubr.bf16.mxu0 %v2800_v26 }
 0x12c   : > { %v732_v9 = vmax.f32 %v692_v7, 0.0 }
 0x12d   : > { %v750_v10 = vpack.c.bf16 %v734_v8, %v733_v3 }
 0x12e   : > { %v749_v11 = vpack.c.bf16 %v732_v9, %v731_v6 }
 0x130   : > { %2464 = vmatprep.mubr.msk.bf16.mxu1 %vm790_vm1, %v749_v11 }
 0x131   : > { %2465 = vmatmul.mubr.msk.bf16.gmra.mrb[28].mxu1 %vm790_vm1, %v750_v10 }
 0x1cc   : > { %v2438_v15 = vpop.f32.mrb[0].mxu1 }
 0x1cd   : > { %v882_v16 = vadd.f32 %v2438_v15, %v3040_v14  ;;  %v873_v17 = vpop.f32.mrb[1].mxu1 }
 0x1ce   : > { %v874_v18 = vadd.f32 %v3040_v14, %v873_v17  ;;  %v2439_v19 = vpop.f32.mrb[2].mxu1 }
 0x1cf   : > { %v885_v20 = vadd.f32 %v2439_v19, %v3040_v14  ;;  %v876_v21 = vpop.f32.mrb[3].mxu1  ;;  %v1002_v23 = vmax.f32 %v882_v16, 0.0 }
 0x1d0   : > { %v877_v22 = vadd.f32 %v3040_v14, %v876_v21  ;;  %v1000_v25 = vmax.f32 %v874_v18, 0.0 }
 0x1d1   : > { %v1003_v24 = vmax.f32 %v885_v20, 0.0 }
 0x1d2   : > { %v1001_v27 = vmax.f32 %v877_v22, 0.0 }
 0x1d3   : > { %v1033_v28 = vpack.c.bf16 %v1003_v24, %v1002_v23 }
 0x1d4   : > { %v1032_v29 = vpack.c.bf16 %v1001_v27, %v1000_v25  ;;  %v2442_v30 = vpop.f32.mrb[4].mxu1 }
 0x1d5   : > { %v898_v31 = vadd.f32 %v2442_v30, %v3040_v14  ;;  %v889_v32 = vpop.f32.mrb[5].mxu1 }
 0x1d6   : > { %v890_v33 = vadd.f32 %v3040_v14, %v889_v32  ;;  %v2443_v34 = vpop.f32.mrb[6].mxu1  ;;  %2220 = vmatmul.mubr.msk.bf16.vlgmr.msra.gmra.mrb[32].mxu0 %vm493_vm0, %v1032_v29  ;;  %2472 = vmatprep.mubr.msk.bf16.mxu1 %vm493_vm0, %v1032_v29 }
 0x1d7   : > { %v1006_v35 = vmax.f32 %v898_v31, 0.0  ;;  %v901_v36 = vadd.f32 %v2443_v34, %v3040_v14  ;;  %v892_v37 = vpop.f32.mrb[7].mxu1  ;;  %2473 = vmatmul.mubr.msk.bf16.vlgmr.msra.gmra.mrb[32].mxu1 %vm493_vm0, %v1033_v28  ;;  %1178 = vmatprep.mubr.bf16.mxu0 %v2800_v26 }
 0x1d8   : > { %v1004_v38 = vmax.f32 %v890_v33, 0.0  ;;  %v893_v39 = vadd.f32 %v3040_v14, %v892_v37 }
 0x1d9   : > { %v1007_v40 = vmax.f32 %v901_v36, 0.0 }
 0x1da   : > { %v1005_v41 = vmax.f32 %v893_v39, 0.0 }
 0x1db   : > { %v1035_v42 = vpack.c.bf16 %v1007_v40, %v1006_v35 }
 0x1dc   : > { %v1034_v43 = vpack.c.bf16 %v1005_v41, %v1004_v38  ;;  %v2446_v44 = vpop.f32.mrb[8].mxu1 }
 0x1dd   : > { %v914_v45 = vadd.f32 %v2446_v44, %v3040_v14  ;;  %v905_v46 = vpop.f32.mrb[9].mxu1 }
 0x1de   : > { %2221 = vmatmul.mubr.msk.bf16.gmra.mrb[36].mxu0 %vm493_vm0, %v1033_v28  ;;  %2476 = vmatprep.mubr.msk.bf16.mxu1 %vm493_vm0, %v1034_v43  ;;  %v906_v47 = vadd.f32 %v3040_v14, %v905_v46  ;;  %v2447_v48 = vpop.f32.mrb[10].mxu1 }
 0x1df   : > { %2477 = vmatmul.mubr.msk.bf16.gmra.mrb[36].mxu1 %vm493_vm0, %v1035_v42  ;;  %v1010_v49 = vmax.f32 %v914_v45, 0.0  ;;  %v917_v50 = vadd.f32 %v2447_v48, %v3040_v14  ;;  %v908_v51 = vpop.f32.mrb[11].mxu1  ;;  %1188 = vmatprep.mubr.bf16.mxu0 %v2800_v26 }
 0x1e0   : > { %v1008_v52 = vmax.f32 %v906_v47, 0.0  ;;  %v909_v53 = vadd.f32 %v3040_v14, %v908_v51 }
 0x1e1   : > { %v1011_v54 = vmax.f32 %v917_v50, 0.0 }
 0x1e2   : > { %v1009_v55 = vmax.f32 %v909_v53, 0.0 }
 0x1e3   : > { %v1037_v56 = vpack.c.bf16 %v1011_v54, %v1010_v49 }
 0x1e4   : > { %v1036_v57 = vpack.c.bf16 %v1009_v55, %v1008_v52  ;;  %v2450_v58 = vpop.f32.mrb[12].mxu1 }
 0x1e5   : > { %v930_v59 = vadd.f32 %v2450_v58, %v3040_v14  ;;  %v921_v60 = vpop.f32.mrb[13].mxu1 }
 0x1e6   : > { %2222 = vmatmul.mubr.msk.bf16.gmra.mrb[40].mxu0 %vm493_vm0, %v1034_v43  ;;  %2480 = vmatprep.mubr.msk.bf16.mxu1 %vm493_vm0, %v1036_v57  ;;  %v922_v61 = vadd.f32 %v3040_v14, %v921_v60  ;;  %v2451_v62 = vpop.f32.mrb[14].mxu1 }
 0x1e7   : > { %2481 = vmatmul.mubr.msk.bf16.gmra.mrb[40].mxu1 %vm493_vm0, %v1037_v56  ;;  %1198 = vmatprep.mubr.bf16.mxu0 %v2800_v26  ;;  %v1014_v63 = vmax.f32 %v930_v59, 0.0  ;;  %v933_v0 = vadd.f32 %v2451_v62, %v3040_v14  ;;  %v924_v1 = vpop.f32.mrb[15].mxu1 }
 0x1e8   : > { %v1012_v2 = vmax.f32 %v922_v61, 0.0  ;;  %v925_v3 = vadd.f32 %v3040_v14, %v924_v1 }
 0x1e9   : > { %v1015_v4 = vmax.f32 %v933_v0, 0.0 }
 0x1ea   : > { %v1013_v5 = vmax.f32 %v925_v3, 0.0  ;;  %v1492_v3 = vld [vmem:[%s3605_s6 + $0xc] sm:$0xff] }
 0x1eb   : > { %v3070_v6 = vpack.c.bf16 %v1015_v4, %v1014_v63  ;;  %v1495_v4 = vld [vmem:[%s3605_s6 + $0x8] ss:$24 sps:$4 sm:$0xff]  }
 0x1ec   : > { %v1038_v7 = vpack.c.bf16 %v1013_v5, %v1012_v2  ;;  %v2454_v8 = vpop.f32.mrb[16].mxu1  ;;  %v1490_v2 = vld [vmem:[%s3605_s6] sm:$0xff]  ;;  %v1497_v5 = vld [vmem:[%s3605_s6 + $0x14] ss:$24 sps:$4 sm:$0xff]  }
 0x1ed   : > { %v946_v9 = vadd.f32 %v2454_v8, %v3040_v14  ;;  %v937_v10 = vpop.f32.mrb[17].mxu1  ;;  %v1557_v8 = vunpack.c.l.bf16 %v1492_v3 }
 0x1ee   : > { %2223 = vmatmul.mubr.msk.bf16.gmra.mrb[44].mxu0 %vm493_vm0, %v1035_v42  ;;  %2484 = vmatprep.mubr.msk.bf16.mxu1 %vm493_vm0, %v1038_v7  ;;  %v938_v11 = vadd.f32 %v3040_v14, %v937_v10  ;;  %v2455_v12 = vpop.f32.mrb[18].mxu1 }
 0x1ef   : > { %1208 = vmatprep.mubr.bf16.mxu0 %v2800_v26  ;;  %2485 = vmatmul.mubr.msk.bf16.gmra.mrb[44].mxu1 %vm493_vm0, %v3070_v6  ;;  %v1018_v13 = vmax.f32 %v946_v9, 0.0  ;;  %v949_v15 = vadd.f32 %v2455_v12, %v3040_v14  ;;  %v940_v16 = vpop.f32.mrb[19].mxu1  ;;  %v1558_v12 = vunpack.c.h.bf16 %v1492_v3  ;;  %v1498_v3 = vld [vmem:[%s3605_s6 + $0x30] sm:$0xff] }
 0x1f0   : > { %v1016_v17 = vmax.f32 %v938_v11, 0.0  ;;  %v941_v18 = vadd.f32 %v3040_v14, %v940_v16  ;;  %v1562_v11 = vunpack.c.h.bf16 %v1495_v4 }
 0x1f1   : > { %v1019_v19 = vmax.f32 %v949_v15, 0.0  ;;  %v1746_v15 = vld [vmem:[%s3606_s7] sm:$0x3] }
 0x1f2   : > { %v1017_v20 = vmax.f32 %v941_v18, 0.0 }
 0x1f3   : > { %v1041_v21 = vpack.c.bf16 %v1019_v19, %v1018_v13  ;;  %v1565_v13 = vunpack.c.h.bf16 %v1497_v5  ;;  %v1556_v19 = vunpack.c.l.bf16 %v1495_v4  ;;  %v1500_v4 = vld [vmem:[%s3605_s6 + $0x3c] sm:$0xff] }
 0x1f4   : > { %v1040_v22 = vpack.c.bf16 %v1017_v20, %v1016_v17  ;;  %v2458_v23 = vpop.f32.mrb[20].mxu1  ;;  %v1559_v20 = vunpack.c.l.bf16 %v1497_v5 }
 0x1f5   : > { %v962_v24 = vadd.f32 %v2458_v23, %v3040_v14  ;;  %v953_v25 = vpop.f32.mrb[21].mxu1 }
 0x1f6   : > { %2224 = vmatmul.mubr.msk.bf16.gmra.mrb[48].mxu0 %vm493_vm0, %v1036_v57  ;;  %2488 = vmatprep.mubr.msk.bf16.mxu1 %vm493_vm0, %v1040_v22  ;;  %v954_v27 = vadd.f32 %v3040_v14, %v953_v25  ;;  %v2459_v28 = vpop.f32.mrb[22].mxu1 }
 0x1f7   : > { %1218 = vmatprep.mubr.bf16.mxu0 %v2800_v26  ;;  %2489 = vmatmul.mubr.msk.bf16.gmra.mrb[48].mxu1 %vm493_vm0, %v1041_v21  ;;  %v1022_v29 = vmax.f32 %v962_v24, 0.0  ;;  %v965_v30 = vadd.f32 %v2459_v28, %v3040_v14  ;;  %v956_v31 = vpop.f32.mrb[23].mxu1 }
 0x1f8   : > { %v1020_v32 = vmax.f32 %v954_v27, 0.0  ;;  %v957_v33 = vadd.f32 %v3040_v14, %v956_v31 }
 0x1f9   : > { %v1023_v34 = vmax.f32 %v965_v30, 0.0 }
 0x1fa   : > { %v1021_v35 = vmax.f32 %v957_v33, 0.0 }
 0x1fb   : > { %v1043_v36 = vpack.c.bf16 %v1023_v34, %v1022_v29 }
 0x1fc   : > { %v1042_v37 = vpack.c.bf16 %v1021_v35, %v1020_v32  ;;  %v2462_v38 = vpop.f32.mrb[24].mxu1  ;;  %v1494_v35 = vld [vmem:[%s3605_s6 + $0x18] sm:$0xff] }
 0x1fd   : > { %v978_v39 = vadd.f32 %v2462_v38, %v3040_v14  ;;  %v969_v40 = vpop.f32.mrb[25].mxu1 }
 0x1fe   : > { %2225 = vmatmul.mubr.msk.bf16.gmra.mrb[52].mxu0 %vm493_vm0, %v1037_v56  ;;  %2492 = vmatprep.mubr.msk.bf16.mxu1 %vm493_vm0, %v1042_v37  ;;  %v970_v41 = vadd.f32 %v3040_v14, %v969_v40  ;;  %v2463_v42 = vpop.f32.mrb[26].mxu1  ;;  %v1503_v40 = vld [vmem:[%s3605_s6 + $0x38] ss:$24 sps:$4 sm:$0xff]  }
 0x1ff   : > { %1228 = vmatprep.mubr.bf16.mxu0 %v2800_v26  ;;  %2493 = vmatmul.mubr.msk.bf16.gmra.mrb[52].mxu1 %vm493_vm0, %v1043_v36  ;;  %v1026_v43 = vmax.f32 %v978_v39, 0.0  ;;  %v981_v44 = vadd.f32 %v2463_v42, %v3040_v14  ;;  %v972_v45 = vpop.f32.mrb[27].mxu1 }
 0x200   : > { %v1024_v46 = vmax.f32 %v970_v41, 0.0  ;;  %v973_v47 = vadd.f32 %v3040_v14, %v972_v45  ;;  %v1505_v41 = vld [vmem:[%s3605_s6 + $0x44] ss:$24 sps:$4 sm:$0xff]   ;;  %v1560_v45 = vunpack.c.l.bf16 %v1494_v35 }
 0x201   : > { %v1027_v48 = vmax.f32 %v981_v44, 0.0 }
 0x202   : > { %v1025_v49 = vmax.f32 %v973_v47, 0.0 }
 0x203   : > { %v1045_v50 = vpack.c.bf16 %v1027_v48, %v1026_v43  ;;  %v1561_v48 = vunpack.c.h.bf16 %v1494_v35 }
 0x204   : > { %v1044_v51 = vpack.c.bf16 %v1025_v49, %v1024_v46  ;;  %v2466_v52 = vpop.f32.mrb[28].mxu1  ;;  %v1574_v49 = vunpack.c.h.bf16 %v1503_v40 }
 0x205   : > { %v994_v53 = vadd.f32 %v2466_v52, %v3040_v14  ;;  %v985_v54 = vpop.f32.mrb[29].mxu1 }
 0x206   : > { %2226 = vmatmul.mubr.msk.bf16.gmra.mrb[56].mxu0 %vm493_vm0, %v1038_v7  ;;  %2496 = vmatprep.mubr.msk.bf16.mxu1 %vm493_vm0, %v1044_v51  ;;  %v986_v55 = vadd.f32 %v3040_v14, %v985_v54  ;;  %v2467_v56 = vpop.f32.mrb[30].mxu1  ;;  %v1555_v7 = vunpack.c.h.bf16 %v1490_v2  ;;  %v1568_v54 = vunpack.c.l.bf16 %v1503_v40 }
 0x207   : > { %1238 = vmatprep.mubr.bf16.mxu0 %v2800_v26  ;;  %2497 = vmatmul.mubr.msk.bf16.gmra.mrb[56].mxu1 %vm493_vm0, %v1045_v50  ;;  %v1030_v57 = vmax.f32 %v994_v53, 0.0  ;;  %v997_v58 = vadd.f32 %v2467_v56, %v3040_v14  ;;  %v988_v59 = vpop.f32.mrb[31].mxu1 }
 0x208   : > { %v1028_v60 = vmax.f32 %v986_v55, 0.0  ;;  %v989_v61 = vadd.f32 %v3040_v14, %v988_v59  ;;  %v1748_v14 = vlaneseq  ;;  %v1571_v55 = vunpack.c.l.bf16 %v1505_v41 }
 0x209   : > { %v1031_v62 = vmax.f32 %v997_v58, 0.0 }
 0x20a   : > { %v1029_v63 = vmax.f32 %v989_v61, 0.0 }
 0x20b   : > { %v1047_v0 = vpack.c.bf16 %v1031_v62, %v1030_v57  ;;  %v1511_v62 = vld [vmem:[%s3605_s6 + $0x68] ss:$24 sps:$4 sm:$0xff]  }
 0x20c   : > { %v1046_v1 = vpack.c.bf16 %v1029_v63, %v1028_v60 }
 0x20e   : > { %2227 = vmatmul.mubr.msk.bf16.gmra.mrb[60].mxu0 %vm493_vm0, %v3070_v6  ;;  %2500 = vmatprep.mubr.msk.bf16.mxu1 %vm493_vm0, %v1046_v1  ;;  %v1554_v6 = vunpack.c.l.bf16 %v1490_v2 }
 0x20f   : > { %1248 = vmatprep.mubr.bf16.mxu0 %v2800_v26  ;;  %2501 = vmatmul.mubr.msk.bf16.gmra.mrb[60].mxu1 %vm493_vm0, %v1047_v0 }
 0x216   : > { %2228 = vmatmul.mubr.msk.bf16.gmra.mrb[64].mxu0 %vm493_vm0, %v1040_v22 }
 0x217   : > { %1258 = vmatprep.mubr.bf16.mxu0 %v2800_v26 }
 0x21e   : > { %2229 = vmatmul.mubr.msk.bf16.gmra.mrb[68].mxu0 %vm493_vm0, %v1041_v21 }
 0x21f   : > { %1268 = vmatprep.mubr.bf16.mxu0 %v2800_v26 }
 0x226   : > { %2230 = vmatmul.mubr.msk.bf16.gmra.mrb[72].mxu0 %vm493_vm0, %v1042_v37 }
 0x227   : > { %1278 = vmatprep.mubr.bf16.mxu0 %v2800_v26 }
 0x22e   : > { %2231 = vmatmul.mubr.msk.bf16.gmra.mrb[76].mxu0 %vm493_vm0, %v1043_v36  ;;  %v1496_v36 = vld [vmem:[%s3605_s6 + $0x24] sm:$0xff] }
 0x22f   : > { %1288 = vmatprep.mubr.bf16.mxu0 %v2800_v26  ;;  %v1563_v46 = vunpack.c.l.bf16 %v1496_v36 }
 0x236   : > { %2232 = vmatmul.mubr.msk.bf16.gmra.mrb[80].mxu0 %vm493_vm0, %v1044_v51  ;;  %v1577_v51 = vunpack.c.h.bf16 %v1505_v41  ;;  %v1502_v41 = vld [vmem:[%s3605_s6 + $0x48] sm:$0xff] }
 0x237   : > { %1298 = vmatprep.mubr.bf16.mxu0 %v2800_v26 }
 0x23e   : > { %2233 = vmatmul.mubr.msk.bf16.gmra.mrb[84].mxu0 %vm493_vm0, %v1045_v50  ;;  %v1564_v50 = vunpack.c.h.bf16 %v1496_v36  ;;  %v1519_v36 = vld [vmem:[%s3605_s6 + $0x98] ss:$24 sps:$4 sm:$0xff]  }
 0x23f   : > { %1308 = vmatprep.mubr.bf16.mxu0 %v2800_v26 }
 0x246   : > { %2234 = vmatmul.mubr.msk.bf16.gmra.mrb[88].mxu0 %vm493_vm0, %v1046_v1 }
 0x247   : > { %1318 = vmatprep.mubr.bf16.mxu0 %v2800_v26  ;;  %v1749_v26 = vshrl.u32 %v1748_v14, 7 }
 0x249   : > { %v1754_v9 = vsub.s32 1, %v1749_v26  ;;  %v1750_v16 = vsub.s32 0, %v1749_v26 }
 0x24b   : > { %v3140_v21 = vrot.slane %v1746_v15, %v1754_v9  ;;  %v3142_v24 = vrot.slane %v1746_v15, %v1750_v16  ;;  %v1580_v15 = vunpack.c.l.bf16 %v1511_v62  ;;  %v1911_v9 = vld [vmem:[%s3607_s8 + $0x60] sm:$0xff] }
 0x24d   : > { %1822 = vmatprep.mubr.f32.mxu1 %v3140_v21 }
 0x24e   : > { %2235 = vmatmul.mubr.msk.bf16.gmra.mrb[92].mxu0 %vm493_vm0, %v1047_v0 }
 0x2a9   : > { %v1170_v10 = vpop.f32.mrb[32].mxu0 }
 0x2aa   : > { %v1172_v17 = vpop.f32.mrb[33].mxu0  ;;  %v2474_v18 = vpop.f32.mrb[32].mxu1  ;;  %v1650_v25 = vmul.f32 %v1554_v6, %v1170_v10  ;;  %v1586_v10 = vunpack.c.h.bf16 %v1511_v62 }
 0x2ab   : > { %v1174_v22 = vpop.f32.mrb[34].mxu0  ;;  %v1363_v23 = vpop.f32.mrb[33].mxu1  ;;  %v1651_v30 = vmul.f32 %v1555_v7, %v1172_v17  ;;  %v3145_v31 = vmul.f32 %v2474_v18, %v1562_v11  ;;  %v1513_v7 = vld [vmem:[%s3605_s6 + $0x74] ss:$24 sps:$4 sm:$0xff]   ;;  %v1567_v17 = vunpack.c.h.bf16 %v1498_v3  ;;  %v1570_v18 = vunpack.c.h.bf16 %v1500_v4 }
 0x2ac   : > { %v1653_v27 = vmul.f32 %v1557_v8, %v1174_v22  ;;  %v1176_v28 = vpop.f32.mrb[35].mxu0  ;;  %v2475_v29 = vpop.f32.mrb[34].mxu1  ;;  %v3155_v38 = vmul.f32 %v1556_v19, %v1363_v23  ;;  %v1589_v19 = vunpack.c.h.bf16 %v1513_v7  ;;  %v1583_v23 = vunpack.c.l.bf16 %v1513_v7 }
 0x2ad   : > { %v1654_v32 = vmul.f32 %v1558_v12, %v1176_v28  ;;  %v3147_v33 = vmul.f32 %v2475_v29, %v1565_v13  ;;  %v1366_v34 = vpop.f32.mrb[35].mxu1  ;;  %v1566_v12 = vunpack.c.l.bf16 %v1498_v3  ;;  %v1569_v13 = vunpack.c.l.bf16 %v1500_v4 }
 0x2ae   : > { %v2525_v37 = vpack.c.bf16 %v1653_v27, %v1650_v25  ;;  %v3157_v39 = vmul.f32 %v1559_v20, %v1366_v34 }
 0x2af   : > { %v2523_v42 = vpack.c.bf16 %v1654_v32, %v1651_v30  ;;  %v2593_v43 = vpack.c.bf16 %v3147_v33, %v3145_v31 }
 0x2b0   : > { %v2589_v44 = vpack.c.bf16 %v3157_v39, %v3155_v38 }
 0x2b1   : > { %v1180_v47 = vpop.f32.mrb[36].mxu0  ;;  %2524 = vmatprep.subr.bf16.mxu1 %v2523_v42 }
 0x2b2   : > { %v1182_v52 = vpop.f32.mrb[37].mxu0  ;;  %v2478_v53 = vpop.f32.mrb[36].mxu1  ;;  %2526 = vmatpush1.bf16.msra.mxu1 %v2525_v37  ;;  %v1656_v58 = vmul.f32 %v1560_v45, %v1180_v47 }
 0x2b3   : > { %v1184_v56 = vpop.f32.mrb[38].mxu0  ;;  %v1379_v57 = vpop.f32.mrb[37].mxu1  ;;  %v1657_v63 = vmul.f32 %v1561_v48, %v1182_v52  ;;  %v3172_v0 = vmul.f32 %v2478_v53, %v1574_v49  ;;  %v1521_v49 = vld [vmem:[%s3605_s6 + $0xa4] ss:$24 sps:$4 sm:$0xff]   ;;  %v1598_v52 = vunpack.c.h.bf16 %v1519_v36  ;;  %v1572_v53 = vunpack.c.l.bf16 %v1502_v41 }
 0x2b4   : > { %v1659_v59 = vmul.f32 %v1563_v46, %v1184_v56  ;;  %v1186_v60 = vpop.f32.mrb[39].mxu0  ;;  %v2479_v61 = vpop.f32.mrb[38].mxu1  ;;  %v3182_v26 = vmul.f32 %v1568_v54, %v1379_v57  ;;  %v1504_v46 = vld [vmem:[%s3605_s6 + $0x54] sm:$0xff]  ;;  %v1592_v56 = vunpack.c.l.bf16 %v1519_v36 }
 0x2b5   : > { %v1660_v1 = vmul.f32 %v1564_v50, %v1186_v60  ;;  %v3174_v14 = vmul.f32 %v2479_v61, %v1577_v51  ;;  %v1382_v2 = vpop.f32.mrb[39].mxu1  ;;  %v1601_v60 = vunpack.c.h.bf16 %v1521_v49 }
 0x2b6   : > { %v2529_v5 = vpack.c.bf16 %v1659_v59, %v1656_v58  ;;  %v3184_v6 = vmul.f32 %v1571_v55, %v1382_v2  ;;  %v1575_v55 = vunpack.c.l.bf16 %v1504_v46  ;;  %v1573_v58 = vunpack.c.h.bf16 %v1502_v41 }
 0x2b7   : > { %v2527_v8 = vpack.c.bf16 %v1660_v1, %v1657_v63  ;;  %v1576_v59 = vunpack.c.h.bf16 %v1504_v46  ;;  %v1595_v63 = vunpack.c.l.bf16 %v1521_v49 }
 0x2b9   : > { %v1190_v16 = vpop.f32.mrb[40].mxu0  ;;  %2528 = vmatprep.subr.bf16.mxu1 %v2527_v8 }
 0x2ba   : > { %v1192_v20 = vpop.f32.mrb[41].mxu0  ;;  %2530 = vmatpush1.bf16.msra.mxu1 %v2529_v5  ;;  %v2482_v22 = vpop.f32.mrb[40].mxu1  ;;  %v1662_v29 = vmul.f32 %v1566_v12, %v1190_v16  ;;  %v1527_v12 = vld [vmem:[%s3605_s6 + $0xc8] ss:$24 sps:$4 sm:$0xff]  }
 0x2bb   : > { %v1194_v25 = vpop.f32.mrb[42].mxu0  ;;  %v3193_v27 = vmul.f32 %v2482_v22, %v1586_v10  ;;  %v1395_v28 = vpop.f32.mrb[41].mxu1  ;;  %v1663_v37 = vmul.f32 %v1567_v17, %v1192_v20  ;;  %v1506_v16 = vld [vmem:[%s3605_s6 + $0x60] sm:$0xff]  ;;  %v1508_v17 = vld [vmem:[%s3605_s6 + $0x6c] sm:$0xff]  ;;  %v1604_v36 = vunpack.c.l.bf16 %v1527_v12 }
 0x2bc   : > { %v1665_v30 = vmul.f32 %v1569_v13, %v1194_v25  ;;  %v1196_v32 = vpop.f32.mrb[43].mxu0  ;;  %v3195_v34 = vmul.f32 %v1580_v15, %v1395_v28  ;;  %v2483_v35 = vpop.f32.mrb[42].mxu1  ;;  %v1582_v41 = vunpack.c.h.bf16 %v1508_v17  ;;  %v1518_v28 = vld [vmem:[%s3605_s6 + $0xa8] sm:$0xff] }
 0x2bd   : > { %v1666_v40 = vmul.f32 %v1570_v18, %v1196_v32  ;;  %v3203_v42 = vmul.f32 %v2483_v35, %v1589_v19  ;;  %v1398_v45 = vpop.f32.mrb[43].mxu1  ;;  %v1581_v32 = vunpack.c.l.bf16 %v1508_v17  ;;  %v1520_v35 = vld [vmem:[%s3605_s6 + $0xb4] sm:$0xff] }
 0x2be   : > { %v2533_v47 = vpack.c.bf16 %v1665_v30, %v1662_v29  ;;  %v3208_v48 = vmul.f32 %v1583_v23, %v1398_v45  ;;  %v1529_v23 = vld [vmem:[%s3605_s6 + $0xd4] ss:$24 sps:$4 sm:$0xff]   ;;  %v1610_v29 = vunpack.c.h.bf16 %v1527_v12  ;;  %v1578_v30 = vunpack.c.l.bf16 %v1506_v16  ;;  %v1899_v12 = vld [vmem:[%s3607_s8] sm:$0xff] }
 0x2bf   : > { %v2531_v50 = vpack.c.bf16 %v1666_v40, %v1663_v37  ;;  %v1579_v40 = vunpack.c.h.bf16 %v1506_v16  ;;  %v1613_v45 = vunpack.c.h.bf16 %v1529_v23  ;;  %v1607_v49 = vunpack.c.l.bf16 %v1529_v23  ;;  %v1918_v23 = vld [vmem:[%s3607_s8 + $0x98] sm:$0xff] }
 0x2c0   : > { %v3616_v33 = vpack.c.bf16 %v3208_v48, %v3195_v34  ;;  %v1932_v34 = vld [vmem:[%s3607_s8 + $0x108] sm:$0xff] }
 0x2c1   : > { %v1200_v57 = vpop.f32.mrb[44].mxu0  ;;  %2532 = vmatprep.subr.bf16.mxu1 %v2531_v50 }
 0x2c2   : > { %v1202_v61 = vpop.f32.mrb[45].mxu0  ;;  %2534 = vmatpush1.bf16.msra.mxu1 %v2533_v47  ;;  %v2486_v62 = vpop.f32.mrb[44].mxu1  ;;  %v1668_v4 = vmul.f32 %v1572_v53, %v1200_v57 }
 0x2c3   : > { %v1204_v1 = vpop.f32.mrb[46].mxu0  ;;  %v3217_v2 = vmul.f32 %v2486_v62, %v1598_v52  ;;  %v1411_v3 = vpop.f32.mrb[45].mxu1  ;;  %v1669_v13 = vmul.f32 %v1573_v58, %v1202_v61 }
 0x2c4   : > { %v1671_v5 = vmul.f32 %v1575_v55, %v1204_v1  ;;  %v1206_v7 = vpop.f32.mrb[47].mxu0  ;;  %v3219_v8 = vmul.f32 %v1592_v56, %v1411_v3  ;;  %v2487_v10 = vpop.f32.mrb[46].mxu1  ;;  %v1535_v55 = vld [vmem:[%s3605_s6 + $0xf8] ss:$24 sps:$4 sm:$0xff]  }
 0x2c5   : > { %v1672_v15 = vmul.f32 %v1576_v59, %v1206_v7  ;;  %v3230_v18 = vmul.f32 %v2487_v10, %v1601_v60  ;;  %v1414_v19 = vpop.f32.mrb[47].mxu1  ;;  %v1510_v59 = vld [vmem:[%s3605_s6 + $0x78] sm:$0xff]  ;;  %v1512_v60 = vld [vmem:[%s3605_s6 + $0x84] sm:$0xff]  ;;  %v1622_v16 = vunpack.c.h.bf16 %v1535_v55 }
 0x2c6   : > { %v2537_v20 = vpack.c.bf16 %v1671_v5, %v1668_v4  ;;  %v3232_v22 = vmul.f32 %v1595_v63, %v1414_v19  ;;  %v3257_v63 = vld [vmem:[%s3605_s6 + $0x104] ss:$24 sps:$4 sm:$0xff]   ;;  %v1916_v10 = vld [vmem:[%s3607_s8 + $0x88] sm:$0xff] }
 0x2c7   : > { %v2535_v25 = vpack.c.bf16 %v1672_v15, %v1669_v13  ;;  %v1915_v7 = vld [vmem:[%s3607_s8 + $0x80] sm:$0xff]  ;;  %v1900_v19 = vld [vmem:[%s3607_s8 + $0x8] sm:$0xff] }
 0x2c8   : > { %v2619_v17 = vpack.c.bf16 %v1916_v10, %v1915_v7 }
 0x2c9   : > { %v1210_v37 = vpop.f32.mrb[48].mxu0  ;;  %2536 = vmatprep.subr.bf16.mxu1 %v2535_v25 }
 0x2ca   : > { %v1212_v46 = vpop.f32.mrb[49].mxu0  ;;  %2538 = vmatpush1.bf16.msra.mxu1 %v2537_v20  ;;  %v2490_v47 = vpop.f32.mrb[48].mxu1  ;;  %v1674_v56 = vmul.f32 %v1578_v30, %v1210_v37  ;;  %v1917_v20 = vld [vmem:[%s3607_s8 + $0x90] sm:$0xff]  ;;  %v2621_v30 = vpack.c.bf16 %v1900_v19, %v1899_v12  ;;  %v1902_v37 = vld [vmem:[%s3607_s8 + $0x18] sm:$0xff]  ;;  %2620 = vmatprep.subr.bf16.mxu0 %v2619_v17 }
 0x2cb   : > { %v1214_v50 = vpop.f32.mrb[50].mxu0  ;;  %v3241_v52 = vmul.f32 %v2490_v47, %v1610_v29  ;;  %v1427_v53 = vpop.f32.mrb[49].mxu1  ;;  %v1675_v1 = vmul.f32 %v1579_v40, %v1212_v46  ;;  %v1919_v40 = vld [vmem:[%s3607_s8 + $0xa0] sm:$0xff]  ;;  %v1616_v47 = vunpack.c.l.bf16 %v1535_v55  ;;  %v1921_v12 = vld [vmem:[%s3607_s8 + $0xb0] sm:$0xff] }
 0x2cc   : > { %v1677_v57 = vmul.f32 %v1581_v32, %v1214_v50  ;;  %v1216_v58 = vpop.f32.mrb[51].mxu0  ;;  %v3252_v61 = vmul.f32 %v1604_v36, %v1427_v53  ;;  %v2491_v62 = vpop.f32.mrb[50].mxu1  ;;  %v2623_v32 = vpack.c.bf16 %v1918_v23, %v1917_v20  ;;  %v1901_v36 = vld [vmem:[%s3607_s8 + $0x10] sm:$0xff]  ;;  %v1585_v53 = vunpack.c.h.bf16 %v1510_v59  ;;  %2622 = vmatpush3.bf16.msra.mxu0 %v2621_v30 }
 0x2cd   : > { %v1678_v3 = vmul.f32 %v1582_v41, %v1216_v58  ;;  %v3259_v4 = vmul.f32 %v2491_v62, %v1613_v45  ;;  %v1430_v5 = vpop.f32.mrb[51].mxu1  ;;  %v1584_v41 = vunpack.c.l.bf16 %v1510_v59  ;;  %v1587_v45 = vunpack.c.l.bf16 %v1512_v60  ;;  %v1904_v59 = vld [vmem:[%s3607_s8 + $0x28] sm:$0xff] }
 0x2ce   : > { %v2541_v13 = vpack.c.bf16 %v1677_v57, %v1674_v56  ;;  %v3270_v15 = vmul.f32 %v1607_v49, %v1430_v5  ;;  %v1920_v49 = vld [vmem:[%s3607_s8 + $0xa8] sm:$0xff]  ;;  %v1588_v56 = vunpack.c.h.bf16 %v1512_v60  ;;  %v1625_v57 = vunpack.c.h.bf16 %v3257_v63  ;;  %2624 = vmatprep.subr.bf16.mxu0 %v2623_v32  ;;  %v1903_v5 = vld [vmem:[%s3607_s8 + $0x20] sm:$0xff]  ;;  %v1514_v32 = vld [vmem:[%s3605_s6 + $0x90] sm:$0xff] }
 0x2cf   : > { %v2539_v25 = vpack.c.bf16 %v1678_v3, %v1675_v1  ;;  %v2591_v29 = vpack.c.bf16 %v3259_v4, %v3241_v52  ;;  %v2625_v58 = vpack.c.bf16 %v1902_v37, %v1901_v36  ;;  %v1619_v3 = vunpack.c.l.bf16 %v3257_v63  ;;  %v1922_v63 = vld [vmem:[%s3607_s8 + $0xb8] sm:$0xff]  ;;  %v1937_v4 = vld [vmem:[%s3607_s8 + $0x130] sm:$0xff] }
 0x2d0   : > { %v2587_v46 = vpack.c.bf16 %v3270_v15, %v3252_v61  ;;  %v2627_v55 = vpack.c.bf16 %v1920_v49, %v1919_v40  ;;  %v1516_v36 = vld [vmem:[%s3605_s6 + $0x9c] sm:$0xff]  ;;  %v1545_v49 = vld [vmem:[%s3605_s6 + $0x134] ss:$24 sps:$4 sm:$0xff]   ;;  %v3612_v61 = vpack.c.bf16 %v3184_v6, %v3182_v26 }
 0x2d1   : > { %v1220_v50 = vpop.f32.mrb[52].mxu0  ;;  %2540 = vmatprep.subr.bf16.mxu1 %v2539_v25  ;;  %2626 = vmatpush3.bf16.msra.mxu0 %v2625_v58  ;;  %v1914_v26 = vld [vmem:[%s3607_s8 + $0x78] sm:$0xff] }
 0x2d2   : > { %v1222_v62 = vpop.f32.mrb[53].mxu0  ;;  %2542 = vmatpush1.bf16.msra.mxu1 %v2541_v13  ;;  %v2494_v1 = vpop.f32.mrb[52].mxu1  ;;  %v1680_v13 = vmul.f32 %v1584_v41, %v1220_v50  ;;  %v2629_v41 = vpack.c.bf16 %v1904_v59, %v1903_v5  ;;  %2628 = vmatprep.subr.bf16.mxu0 %v2627_v55  ;;  %v2631_v50 = vpack.c.bf16 %v1922_v63, %v1921_v12  ;;  %v1590_v55 = vunpack.c.l.bf16 %v1514_v32  ;;  %v1938_v15 = vld [vmem:[%s3607_s8 + $0x138] sm:$0xff] }
 0x2d3   : > { %v1224_v60 = vpop.f32.mrb[54].mxu0  ;;  %v3305_v7 = vmul.f32 %v2494_v1, %v1622_v16  ;;  %v1443_v10 = vpop.f32.mrb[53].mxu1  ;;  %v1543_v16 = vld [vmem:[%s3605_s6 + $0x128] ss:$24 sps:$4 sm:$0xff]   ;;  %v1681_v25 = vmul.f32 %v1585_v53, %v1222_v62  ;;  %v1905_v53 = vld [vmem:[%s3607_s8 + $0x30] sm:$0xff]  ;;  %v1593_v5 = vunpack.c.l.bf16 %v1516_v36  ;;  %v1591_v12 = vunpack.c.h.bf16 %v1514_v32 }
 0x2d4   : > { %v1683_v17 = vmul.f32 %v1587_v45, %v1224_v60  ;;  %v1226_v19 = vpop.f32.mrb[55].mxu0  ;;  %v3313_v20 = vmul.f32 %v1616_v47, %v1443_v10  ;;  %v2495_v23 = vpop.f32.mrb[54].mxu1  ;;  %v1634_v62 = vunpack.c.h.bf16 %v1543_v16  ;;  %v1923_v1 = vld [vmem:[%s3607_s8 + $0xc0] sm:$0xff]  ;;  %v1628_v60 = vunpack.c.l.bf16 %v1543_v16  ;;  %v1908_v16 = vld [vmem:[%s3607_s8 + $0x48] sm:$0xff] }
 0x2d5   : > { %v1684_v30 = vmul.f32 %v1588_v56, %v1226_v19  ;;  %v3324_v37 = vmul.f32 %v2495_v23, %v1625_v57  ;;  %v1446_v40 = vpop.f32.mrb[55].mxu1  ;;  %v1906_v56 = vld [vmem:[%s3607_s8 + $0x38] sm:$0xff]  ;;  %v1594_v63 = vunpack.c.h.bf16 %v1516_v36  ;;  %2630 = vmatpush3.bf16.msra.mxu0 %v2629_v41  ;;  %v1925_v41 = vld [vmem:[%s3607_s8 + $0xd0] sm:$0xff] }
 0x2d6   : > { %v2545_v45 = vpack.c.bf16 %v1683_v17, %v1680_v13  ;;  %v3326_v47 = vmul.f32 %v1619_v3, %v1446_v40  ;;  %v1924_v3 = vld [vmem:[%s3607_s8 + $0xc8] sm:$0xff]  ;;  %v1637_v13 = vunpack.c.h.bf16 %v1545_v49  ;;  %v2633_v17 = vpack.c.bf16 %v1906_v56, %v1905_v53  ;;  %2632 = vmatprep.subr.bf16.mxu0 %v2631_v50  ;;  %v1907_v40 = vld [vmem:[%s3607_s8 + $0x40] sm:$0xff] }
 0x2d7   : > { %v2543_v57 = vpack.c.bf16 %v1684_v30, %v1681_v25  ;;  %v1631_v25 = vunpack.c.l.bf16 %v1545_v49  ;;  %v2635_v30 = vpack.c.bf16 %v1924_v3, %v1923_v1  ;;  %v3613_v38 = vpack.c.bf16 %v3324_v37, %v3305_v7 }
 0x2d8   : > { %v2595_v59 = vpack.c.bf16 %v3326_v47, %v3313_v20 }
 0x2d9   : > { %v1230_v10 = vpop.f32.mrb[56].mxu0  ;;  %2544 = vmatprep.subr.bf16.mxu1 %v2543_v57  ;;  %2634 = vmatpush3.bf16.msra.mxu0 %v2633_v17 }
 0x2da   : > { %v1232_v19 = vpop.f32.mrb[57].mxu0  ;;  %2546 = vmatpush1.bf16.msra.mxu1 %v2545_v45  ;;  %v2498_v23 = vpop.f32.mrb[56].mxu1  ;;  %v1926_v45 = vld [vmem:[%s3607_s8 + $0xd8] sm:$0xff]  ;;  %v1686_v49 = vmul.f32 %v1590_v55, %v1230_v10  ;;  %2636 = vmatprep.subr.bf16.mxu0 %v2635_v30  ;;  %v1928_v30 = vld [vmem:[%s3607_s8 + $0xe8] sm:$0xff] }
 0x2db   : > { %v1234_v57 = vpop.f32.mrb[58].mxu0  ;;  %v3353_v32 = vmul.f32 %v2498_v23, %v1634_v62  ;;  %v1459_v36 = vpop.f32.mrb[57].mxu1  ;;  %v1551_v62 = vld [vmem:[%s3605_s6 + $0x158] ss:$24 sps:$4 sm:$0xff]   ;;  %v1687_v3 = vmul.f32 %v1591_v12, %v1232_v19  ;;  %v1553_v12 = vld [vmem:[%s3605_s6 + $0x164] ss:$24 sps:$4 sm:$0xff]  }
 0x2dc   : > { %v1689_v50 = vmul.f32 %v1593_v5, %v1234_v57  ;;  %v1236_v53 = vpop.f32.mrb[59].mxu0  ;;  %v3361_v56 = vmul.f32 %v1628_v60, %v1459_v36  ;;  %v2499_v1 = vpop.f32.mrb[58].mxu1  ;;  %v2637_v60 = vpack.c.bf16 %v1908_v16, %v1907_v40  ;;  %v1909_v19 = vld [vmem:[%s3607_s8 + $0x50] sm:$0xff]  ;;  %v1927_v40 = vld [vmem:[%s3607_s8 + $0xe0] sm:$0xff]  ;;  %v1596_v16 = vunpack.c.l.bf16 %v1518_v28 }
 0x2dd   : > { %v1690_v23 = vmul.f32 %v1594_v63, %v1236_v53  ;;  %v3372_v55 = vmul.f32 %v2499_v1, %v1637_v13  ;;  %v1462_v5 = vpop.f32.mrb[59].mxu1  ;;  %v2639_v63 = vpack.c.bf16 %v1926_v45, %v1925_v41  ;;  %v1910_v13 = vld [vmem:[%s3607_s8 + $0x58] sm:$0xff]  ;;  %v1599_v41 = vunpack.c.l.bf16 %v1520_v35 }
 0x2de   : > { %v2549_v10 = vpack.c.bf16 %v1689_v50, %v1686_v49  ;;  %v3374_v57 = vmul.f32 %v1631_v25, %v1462_v5  ;;  %v1646_v25 = vunpack.c.h.bf16 %v1551_v62  ;;  %v1640_v49 = vunpack.c.l.bf16 %v1551_v62  ;;  %2638 = vmatpush3.bf16.msra.mxu0 %v2637_v60  ;;  %v1912_v62 = vld [vmem:[%s3607_s8 + $0x68] sm:$0xff]  ;;  %v1929_v60 = vld [vmem:[%s3607_s8 + $0xf0] sm:$0xff] }
 0x2df   : > { %v2547_v36 = vpack.c.bf16 %v1690_v23, %v1687_v3  ;;  %v1597_v53 = vunpack.c.h.bf16 %v1518_v28  ;;  %v1600_v1 = vunpack.c.h.bf16 %v1520_v35  ;;  %v1649_v3 = vunpack.c.h.bf16 %v1553_v12  ;;  %2640 = vmatprep.subr.bf16.mxu0 %v2639_v63 }
 0x2e0   : > { %v2641_v23 = vpack.c.bf16 %v1910_v13, %v1909_v19  ;;  %v1643_v17 = vunpack.c.l.bf16 %v1553_v12  ;;  %v2643_v54 = vpack.c.bf16 %v1928_v30, %v1927_v40  ;;  %v3615_v31 = vpack.c.bf16 %v3374_v57, %v3361_v56 }
 0x2e1   : > { %v1240_v50 = vpop.f32.mrb[60].mxu0  ;;  %2548 = vmatprep.subr.bf16.mxu1 %v2547_v36  ;;  %v3617_v39 = vpack.c.bf16 %v3372_v55, %v3353_v32  ;;  %v1939_v55 = vld [vmem:[%s3608_s9] sm:$0x1] }
 0x2e2   : > { %v1242_v5 = vpop.f32.mrb[61].mxu0  ;;  %2550 = vmatpush1.bf16.msra.mxu1 %v2549_v10  ;;  %v2502_v51 = vpop.f32.mrb[60].mxu1  ;;  %v1930_v10 = vld [vmem:[%s3607_s8 + $0xf8] sm:$0xff]  ;;  %v1692_v12 = vmul.f32 %v1596_v16, %v1240_v50  ;;  %2642 = vmatpush3.bf16.msra.mxu0 %v2641_v23  ;;  %v2645_v16 = vpack.c.bf16 %v1912_v62, %v1911_v9 }
 0x2e3   : > { %v1244_v36 = vpop.f32.mrb[62].mxu0  ;;  %v3401_v28 = vmul.f32 %v2502_v51, %v1646_v25  ;;  %v1475_v35 = vpop.f32.mrb[61].mxu1  ;;  %v1693_v30 = vmul.f32 %v1597_v53, %v1242_v5  ;;  %v1522_v51 = vld [vmem:[%s3605_s6 + $0xc0] sm:$0xff]  ;;  %v1524_v25 = vld [vmem:[%s3605_s6 + $0xcc] sm:$0xff]  ;;  %2644 = vmatprep.subr.bf16.mxu0 %v2643_v54 }
 0x2e4   : > { %v1695_v63 = vmul.f32 %v1599_v41, %v1244_v36  ;;  %v1246_v19 = vpop.f32.mrb[63].mxu0  ;;  %v3409_v13 = vmul.f32 %v1640_v49, %v1475_v35  ;;  %v2503_v40 = vpop.f32.mrb[62].mxu1  ;;  %v2647_v49 = vpack.c.bf16 %v1930_v10, %v1929_v60  ;;  %v1602_v5 = vunpack.c.l.bf16 %v1522_v51  ;;  %v1526_v60 = vld [vmem:[%s3605_s6 + $0xd8] sm:$0xff]  ;;  %v1528_v10 = vld [vmem:[%s3605_s6 + $0xe4] sm:$0xff] }
 0x2e5   : > { %v1696_v45 = vmul.f32 %v1600_v1, %v1246_v19  ;;  %v3417_v58 = vmul.f32 %v2503_v40, %v1649_v3  ;;  %v1478_v11 = vpop.f32.mrb[63].mxu1  ;;  %v1605_v36 = vunpack.c.l.bf16 %v1524_v25  ;;  %v1603_v3 = vunpack.c.h.bf16 %v1522_v51 }
 0x2e6   : > { %v2553_v41 = vpack.c.bf16 %v1695_v63, %v1692_v12  ;;  %v3419_v50 = vmul.f32 %v1643_v17, %v1478_v11  ;;  %v1606_v40 = vunpack.c.h.bf16 %v1524_v25  ;;  %2646 = vmatpush3.bf16.msra.mxu0 %v2645_v16  ;;  %v1611_v51 = vunpack.c.l.bf16 %v1528_v10 }
 0x2e7   : > { %v2551_v53 = vpack.c.bf16 %v1696_v45, %v1693_v30  ;;  %v2615_v1 = vpack.c.bf16 %v3417_v58, %v3401_v28  ;;  %2648 = vmatprep.subr.bf16.mxu0 %v2647_v49  ;;  %v1608_v30 = vunpack.c.l.bf16 %v1526_v60  ;;  %v1609_v16 = vunpack.c.h.bf16 %v1526_v60 }
 0x2e8   : > { %v2611_v35 = vpack.c.bf16 %v3419_v50, %v3409_v13 }
 0x2e9   : > { %v1250_v19 = vpop.f32.mrb[64].mxu0  ;;  %2552 = vmatprep.subr.bf16.mxu1 %v2551_v53 }
 0x2ea   : > { %v1252_v9 = vpop.f32.mrb[65].mxu0  ;;  %2554 = vmatpush1.bf16.msra.mxu1 %v2553_v41  ;;  %v1698_v54 = vmul.f32 %v1602_v5, %v1250_v19  ;;  %v1612_v41 = vunpack.c.h.bf16 %v1528_v10 }
 0x2eb   : > { %v1254_v11 = vpop.f32.mrb[66].mxu0  ;;  %v1699_v23 = vmul.f32 %v1603_v3, %v1252_v9  ;;  %v1530_v9 = vld [vmem:[%s3605_s6 + $0xf0] sm:$0xff] }
 0x2ec   : > { %v1701_v17 = vmul.f32 %v1605_v36, %v1254_v11  ;;  %v1256_v45 = vpop.f32.mrb[67].mxu0  ;;  %v1532_v11 = vld [vmem:[%s3605_s6 + $0xfc] sm:$0xff]  ;;  %v1615_v60 = vunpack.c.h.bf16 %v1530_v9 }
 0x2ed   : > { %v1702_v62 = vmul.f32 %v1606_v40, %v1256_v45  ;;  %v1614_v45 = vunpack.c.l.bf16 %v1530_v9  ;;  %v1618_v10 = vunpack.c.h.bf16 %v1532_v11 }
 0x2ee   : > { %v2557_v12 = vpack.c.bf16 %v1701_v17, %v1698_v54 }
 0x2ef   : > { %v2555_v63 = vpack.c.bf16 %v1702_v62, %v1699_v23  ;;  %v1617_v23 = vunpack.c.l.bf16 %v1532_v11 }
 0x2f1   : > { %v1260_v25 = vpop.f32.mrb[68].mxu0  ;;  %2556 = vmatprep.subr.bf16.mxu1 %v2555_v63 }
 0x2f2   : > { %v1262_v49 = vpop.f32.mrb[69].mxu0  ;;  %2558 = vmatpush1.bf16.msra.mxu1 %v2557_v12  ;;  %v1704_v5 = vmul.f32 %v1608_v30, %v1260_v25 }
 0x2f3   : > { %v1264_v53 = vpop.f32.mrb[70].mxu0  ;;  %v1705_v3 = vmul.f32 %v1609_v16, %v1262_v49  ;;  %v1534_v49 = vld [vmem:[%s3605_s6 + $0x108] sm:$0xff] }
 0x2f4   : > { %v1707_v36 = vmul.f32 %v1611_v51, %v1264_v53  ;;  %v1266_v19 = vpop.f32.mrb[71].mxu0  ;;  %v1536_v53 = vld [vmem:[%s3605_s6 + $0x114] sm:$0xff]  ;;  %v1621_v9 = vunpack.c.h.bf16 %v1534_v49 }
 0x2f5   : > { %v1708_v40 = vmul.f32 %v1612_v41, %v1266_v19  ;;  %v1620_v19 = vunpack.c.l.bf16 %v1534_v49  ;;  %v1624_v11 = vunpack.c.h.bf16 %v1536_v53 }
 0x2f6   : > { %v2561_v54 = vpack.c.bf16 %v1707_v36, %v1704_v5 }
 0x2f7   : > { %v2559_v17 = vpack.c.bf16 %v1708_v40, %v1705_v3  ;;  %v1623_v3 = vunpack.c.l.bf16 %v1536_v53 }
 0x2f9   : > { %v1270_v62 = vpop.f32.mrb[72].mxu0  ;;  %2560 = vmatprep.subr.bf16.mxu1 %v2559_v17 }
 0x2fa   : > { %v1272_v12 = vpop.f32.mrb[73].mxu0  ;;  %2562 = vmatpush1.bf16.msra.mxu1 %v2561_v54  ;;  %v1710_v30 = vmul.f32 %v1614_v45, %v1270_v62 }
 0x2fb   : > { %v1274_v63 = vpop.f32.mrb[74].mxu0  ;;  %v1711_v16 = vmul.f32 %v1615_v60, %v1272_v12  ;;  %v1538_v12 = vld [vmem:[%s3605_s6 + $0x120] sm:$0xff] }
 0x2fc   : > { %v1713_v51 = vmul.f32 %v1617_v23, %v1274_v63  ;;  %v1276_v25 = vpop.f32.mrb[75].mxu0  ;;  %v1540_v63 = vld [vmem:[%s3605_s6 + $0x12c] sm:$0xff]  ;;  %v1627_v49 = vunpack.c.h.bf16 %v1538_v12 }
 0x2fd   : > { %v1714_v41 = vmul.f32 %v1618_v10, %v1276_v25  ;;  %v1626_v25 = vunpack.c.l.bf16 %v1538_v12  ;;  %v1630_v53 = vunpack.c.h.bf16 %v1540_v63 }
 0x2fe   : > { %v2565_v5 = vpack.c.bf16 %v1713_v51, %v1710_v30 }
 0x2ff   : > { %v2563_v36 = vpack.c.bf16 %v1714_v41, %v1711_v16  ;;  %v1629_v16 = vunpack.c.l.bf16 %v1540_v63 }
 0x301   : > { %v1280_v40 = vpop.f32.mrb[76].mxu0  ;;  %2564 = vmatprep.subr.bf16.mxu1 %v2563_v36 }
 0x302   : > { %v1282_v54 = vpop.f32.mrb[77].mxu0  ;;  %2566 = vmatpush1.bf16.msra.mxu1 %v2565_v5  ;;  %v1716_v45 = vmul.f32 %v1620_v19, %v1280_v40 }
 0x303   : > { %v1284_v17 = vpop.f32.mrb[78].mxu0  ;;  %v1717_v60 = vmul.f32 %v1621_v9, %v1282_v54  ;;  %v1542_v54 = vld [vmem:[%s3605_s6 + $0x138] sm:$0xff] }
 0x304   : > { %v1719_v23 = vmul.f32 %v1623_v3, %v1284_v17  ;;  %v1286_v62 = vpop.f32.mrb[79].mxu0  ;;  %v1544_v17 = vld [vmem:[%s3605_s6 + $0x144] sm:$0xff]  ;;  %v1633_v12 = vunpack.c.h.bf16 %v1542_v54 }
 0x305   : > { %v1720_v10 = vmul.f32 %v1624_v11, %v1286_v62  ;;  %v1632_v62 = vunpack.c.l.bf16 %v1542_v54  ;;  %v1636_v63 = vunpack.c.h.bf16 %v1544_v17 }
 0x306   : > { %v2569_v30 = vpack.c.bf16 %v1719_v23, %v1716_v45 }
 0x307   : > { %v2567_v51 = vpack.c.bf16 %v1720_v10, %v1717_v60  ;;  %v1635_v60 = vunpack.c.l.bf16 %v1544_v17 }
 0x309   : > { %v1290_v41 = vpop.f32.mrb[80].mxu0  ;;  %2568 = vmatprep.subr.bf16.mxu1 %v2567_v51 }
 0x30a   : > { %v1292_v5 = vpop.f32.mrb[81].mxu0  ;;  %2570 = vmatpush1.bf16.msra.mxu1 %v2569_v30  ;;  %v1722_v19 = vmul.f32 %v1626_v25, %v1290_v41 }
 0x30b   : > { %v1294_v36 = vpop.f32.mrb[82].mxu0  ;;  %v1723_v9 = vmul.f32 %v1627_v49, %v1292_v5  ;;  %v1546_v5 = vld [vmem:[%s3605_s6 + $0x150] sm:$0xff] }
 0x30c   : > { %v1725_v3 = vmul.f32 %v1629_v16, %v1294_v36  ;;  %v1296_v40 = vpop.f32.mrb[83].mxu0  ;;  %v1548_v36 = vld [vmem:[%s3605_s6 + $0x15c] sm:$0xff]  ;;  %v1639_v54 = vunpack.c.h.bf16 %v1546_v5 }
 0x30d   : > { %v1726_v11 = vmul.f32 %v1630_v53, %v1296_v40  ;;  %v1638_v40 = vunpack.c.l.bf16 %v1546_v5  ;;  %v1642_v17 = vunpack.c.h.bf16 %v1548_v36 }
 0x30e   : > { %v2573_v45 = vpack.c.bf16 %v1725_v3, %v1722_v19 }
 0x30f   : > { %v2571_v23 = vpack.c.bf16 %v1726_v11, %v1723_v9  ;;  %v1641_v9 = vunpack.c.l.bf16 %v1548_v36 }
 0x311   : > { %v1300_v10 = vpop.f32.mrb[84].mxu0  ;;  %2572 = vmatprep.subr.bf16.mxu1 %v2571_v23 }
 0x312   : > { %v1302_v30 = vpop.f32.mrb[85].mxu0  ;;  %2574 = vmatpush1.bf16.msra.mxu1 %v2573_v45  ;;  %v1728_v25 = vmul.f32 %v1632_v62, %v1300_v10 }
 0x313   : > { %v1304_v51 = vpop.f32.mrb[86].mxu0  ;;  %v1729_v49 = vmul.f32 %v1633_v12, %v1302_v30  ;;  %v1550_v30 = vld [vmem:[%s3605_s6 + $0x168] sm:$0xff] }
 0x314   : > { %v1731_v16 = vmul.f32 %v1635_v60, %v1304_v51  ;;  %v1306_v41 = vpop.f32.mrb[87].mxu0  ;;  %v1552_v51 = vld [vmem:[%s3605_s6 + $0x174] sm:$0xff]  ;;  %v1645_v5 = vunpack.c.h.bf16 %v1550_v30 }
 0x315   : > { %v1732_v53 = vmul.f32 %v1636_v63, %v1306_v41  ;;  %v1644_v41 = vunpack.c.l.bf16 %v1550_v30  ;;  %v1648_v36 = vunpack.c.h.bf16 %v1552_v51 }
 0x316   : > { %v2577_v19 = vpack.c.bf16 %v1731_v16, %v1728_v25 }
 0x317   : > { %v2575_v3 = vpack.c.bf16 %v1732_v53, %v1729_v49  ;;  %v1647_v49 = vunpack.c.l.bf16 %v1552_v51 }
 0x319   : > { %v1310_v11 = vpop.f32.mrb[88].mxu0  ;;  %2576 = vmatprep.subr.bf16.mxu1 %v2575_v3 }
 0x31a   : > { %v1312_v45 = vpop.f32.mrb[89].mxu0  ;;  %2578 = vmatpush1.bf16.msra.mxu1 %v2577_v19  ;;  %v1734_v62 = vmul.f32 %v1638_v40, %v1310_v11 }
 0x31b   : > { %v1314_v23 = vpop.f32.mrb[90].mxu0  ;;  %v1735_v12 = vmul.f32 %v1639_v54, %v1312_v45 }
 0x31c   : > { %v1737_v60 = vmul.f32 %v1641_v9, %v1314_v23  ;;  %v1316_v10 = vpop.f32.mrb[91].mxu0 }
 0x31d   : > { %v1738_v63 = vmul.f32 %v1642_v17, %v1316_v10 }
 0x31e   : > { %v2581_v25 = vpack.c.bf16 %v1737_v60, %v1734_v62 }
 0x31f   : > { %v2579_v16 = vpack.c.bf16 %v1738_v63, %v1735_v12 }
 0x321   : > { %v1320_v53 = vpop.f32.mrb[92].mxu0  ;;  %2580 = vmatprep.subr.bf16.mxu1 %v2579_v16 }
 0x322   : > { %v1322_v19 = vpop.f32.mrb[93].mxu0  ;;  %2582 = vmatpush1.bf16.msra.mxu1 %v2581_v25  ;;  %v1740_v40 = vmul.f32 %v1644_v41, %v1320_v53 }
 0x323   : > { %v1324_v3 = vpop.f32.mrb[94].mxu0  ;;  %v1741_v54 = vmul.f32 %v1645_v5, %v1322_v19 }
 0x324   : > { %v1743_v9 = vmul.f32 %v1647_v49, %v1324_v3  ;;  %v1326_v11 = vpop.f32.mrb[95].mxu0 }
 0x325   : > { %v1744_v17 = vmul.f32 %v1648_v36, %v1326_v11 }
 0x326   : > { %v2585_v45 = vpack.c.bf16 %v1743_v9, %v1740_v40 }
 0x327   : > { %v2583_v23 = vpack.c.bf16 %v1744_v17, %v1741_v54 }
 0x329   : > { %2584 = vmatprep.subr.bf16.mxu1 %v2583_v23 }
 0x32a   : > { %2586 = vmatpush1.bf16.msra.mxu1 %v2585_v45 }
 0x32b   : > { %2588 = vmatprep.subr.bf16.mxu1 %v2587_v46  ;;  %v2803_v46 = vmov 0.0  }
 0x32d   : > { %1823 = vmatmul.mubr.f32.vlgmr.msra.gmra.mrb[64].mxu1 %v3142_v24 }
 0x32e   : > { %2590 = vmatpush3.bf16.msra.mxu1 %v2589_v44  ;;  %1893 = vmatprep.mubr.f32.mxu1 %v3140_v21  ;;  %v3614_v21 = vpack.c.bf16 %v3174_v14, %v3172_v0  ;;  %v3619_v44 = vpack.c.bf16 %v3232_v22, %v3219_v8  ;;  %v3620_v0 = vpack.c.bf16 %v3230_v18, %v3217_v2  ;;  %v1913_v14 = vld [vmem:[%s3607_s8 + $0x70] sm:$0xff]  ;;  %v1934_v2 = vld [vmem:[%s3607_s8 + $0x118] sm:$0xff]  ;;  %v1935_v18 = vld [vmem:[%s3607_s8 + $0x120] sm:$0xff] }
 0x32f   : > { %2592 = vmatprep.subr.bf16.mxu1 %v2591_v29  ;;  %v2649_v6 = vpack.c.bf16 %v1914_v26, %v1913_v14  ;;  %v1936_v22 = vld [vmem:[%s3607_s8 + $0x128] sm:$0xff]  ;;  %v2661_v29 = vpack.c.bf16 %v1938_v15, %v1937_v4 }
 0x330   : > { %v2658_v52 = vpack.c.bf16 %v1936_v22, %v1935_v18 }
 0x331   : > { %2650 = vmatpush3.bf16.msra.mxu0 %v2649_v6 }
 0x332   : > { %2594 = vmatpush3.bf16.msra.mxu1 %v2593_v43  ;;  %v3618_v43 = vpack.c.bf16 %v3203_v42, %v3193_v27  ;;  %v1931_v27 = vld [vmem:[%s3607_s8 + $0x100] sm:$0xff]  ;;  %v2801_v42 = vmov 0.0|0.0  }
 0x333   : > { %2596 = vmatprep.subr.bf16.mxu1 %v2595_v59  ;;  %v2652_v48 = vpack.c.bf16 %v1932_v34, %v1931_v27 }
 0x336   : > { %2598 = vmatpush3.bf16.msra.mxu1 %v3612_v61 }
 0x337   : > { %2600 = vmatprep.subr.bf16.mxu1 %v3613_v38 }
 0x33a   : > { %2602 = vmatpush3.bf16.msra.mxu1 %v3614_v21 }
 0x33b   : > { %2604 = vmatprep.subr.bf16.mxu1 %v3615_v31 }
 0x33e   : > { %2606 = vmatpush3.bf16.msra.mxu1 %v3616_v33 }
 0x33f   : > { %2608 = vmatprep.subr.bf16.mxu1 %v3617_v39 }
 0x342   : > { %2610 = vmatpush3.bf16.msra.mxu1 %v3618_v43 }
 0x343   : > { %2612 = vmatprep.subr.bf16.mxu1 %v2611_v35 }
 0x346   : > { %2614 = vmatpush3.bf16.msra.mxu1 %v3619_v44 }
 0x347   : > { %2616 = vmatprep.subr.bf16.mxu1 %v2615_v1 }
 0x34a   : > { %2618 = vmatpush3.bf16.msra.mxu1 %v3620_v0 }
 0x34b   : > { %2651 = vmatprep.subr.bf16.mxu1 %v2801_v42 }
 0x34d   : > { %1894 = vmatmul.mubr.f32.vlgmr.msra.gmra.mrb[66].mxu1 %v3142_v24  ;;  %v1933_v24 = vld [vmem:[%s3607_s8 + $0x110] sm:$0xff] }
 0x34e   : > { %2653 = vmatpush3.bf16.msra.mxu1 %v2652_v48  ;;  %v2655_v8 = vpack.c.bf16 %v1934_v2, %v1933_v24  ;;  %2520 = vmatprep.mubr.msk.f32.mxu1 %vm2802_vm2, %v2803_v46 }
 0x34f   : > { %2654 = vmatprep.subr.bf16.mxu1 %v2801_v42 }
 0x352   : > { %2656 = vmatpush3.bf16.msra.mxu1 %v2655_v8 }
 0x353   : > { %2657 = vmatprep.subr.bf16.mxu1 %v2801_v42 }
 0x356   : > { %2659 = vmatpush3.bf16.msra.mxu1 %v2658_v52 }
 0x357   : > { %2660 = vmatprep.subr.bf16.mxu1 %v2801_v42 }
 0x35a   : > { %2662 = vmatpush3.bf16.msra.mxu1 %v2661_v29 }
 0x400   : > { %v1824_v7 = vpop.f32.mrb[64].mxu1 }
 0x401   : > { %v1826_v20 = vpop.f32.mrb[65].mxu1 }
 0x402   : > { %2007 = vmatprep.mubr.f32.mxu0 %v1826_v20 }
 0x403   : > { %2008 = vmatmul.mubr.f32.vlgmr.msra.gmra.mrb[96].mxu0 %v1824_v7 }
 0x420   : > { %v2345_v37 = vpop.f32.mrb[66].mxu1 }
 0x421   : > { %v2346_v47 = vpop.f32.mrb[67].mxu1 }
 0x422   : > { %v2347_v58 = vadd.f32 %v2346_v47, %v2345_v37 }
 0x424   : > { %2521 = vmatmul.mubr.msk.f32.vlgmr.msra.gmra.mrb[68].mxu1 %vm790_vm1, %v2347_v58 }
 0x4d6   : > { %v2380_v59 = vpop.f32.mrb[96].mxu0 }
 0x4d7   : > { %v2381_v32 = vpop.f32.mrb[97].mxu0 }
 0x4d8   : > { %v2382_v56 = vadd.f32 %v2381_v32, %v2380_v59 }
 0x4da   : > { %v2010_v57 = vadd.f32 %v2382_v56, %v1939_v55 }
 0x4f7   : > { %v2079_v28 = vpop.f32.mrb[68].mxu1 }
 0x4f8   : > { %v2080_v13 = vadd.f32 %v2079_v28, %v2010_v57  ;;  %v2522_v50 = vpop.f32.mrb[69].mxu1 }
 0x4fa   : > { %2083 = vst [vmem:[%s351_s11] sm:$0x1] %v2080_v13 }
 0x4fb   : > { %2749 = shalt.err (!%p2746_p3)
}
 0x4fc   : > { %s2750_s27 = scalar_lea.hbm %s3557_s21, 16  ;;  %s2754_s18 = scalar_lea.hbm %s3609_s10, 32 }
 0x4fd   : > { %p2751_p4 = scmp.ne.s32.totalorder %s3557_s21, %s2750_s27  ;;  %p2755_p9 = scmp.lt.u32.totalorder %s3557_s21, %s3609_s10 }
 0x4fe   : > { %p2756_p10 = scmp.lt.u32.totalorder %s2754_s18, %s2750_s27  ;;  %p2758_p12 = scmp.lt.u32.totalorder %s2750_s27, %s3557_s21 }
 0x4ff   : > { %p2752_p7 = pnand %p2751_p4, %p2898_p5 }
 0x500   : > { %p2757_p11 = por %p2756_p10, %p2755_p9 }
 0x501   : > { %p2753_p8 = pneg %p2752_p7 }
 0x502   : > { %p2759_p13 = por %p2758_p12, %p2757_p11 }
 0x504   : > { %p2760_p0 = pnand %p2759_p13, %p2753_p8 }
 0x506   : > { %2763 = shalt.err (!%p2760_p0)
}
 0x507   : > { %2663 = dma.vmem_to_hbm [thread:$0]  (%p2898_p5), %s3559_s12, 16, %s3557_s21, %s2085_s25  }
 0x508 PF: > { %p2669_p1 = scmp.ge.s32.totalorder %s2798_s16, 2  ;;  %s2109_s26 = sand.u32 1, %s2786_s13  }
 0x509   : > { %s2110_s28 = scalar_lea.sflag [#allocation3], %s2109_s26 }
 0x50a   : > { %p2666_p2 = pnand %p2669_p1, %p2902_p6 }
 0x50c   : > { %2781 = dma.done.wait (!%p2666_p2), %s2110_s28, 16  }
 0x50d   : > { %2783 = vsyncadd (!%p2666_p2), %s2110_s28, 4294967280  ;;  %p20_p3 = scmp.ge.s32.totalorder %s2885_s19, 4   ;;  %s3621_s13 = smov %s2790_s14 }
 0x50e   : > { %s3622_s14 = smov %s2794_s15  ;;  %s3623_s15 = smov %s2896_s22 }
 0x50f   : > { %s3624_s16 = smov %s2885_s19  ;;  %22 = sbr.rel (!%p20_p3) target bundleno = 3 (0x3), region = 95 }
 0x516   :  { %2114 = vsyncpa [#allocation3], 1 }
 0x517   :  { %2116 = vsyncpa [#allocation3 + $0x1], 1 }

</bundles_post_ra>
